<compile_context>
chip_gen: v5e
topology: v5e:2x2
jax: 0.10.0
libtpu: 0.0.40
codegen_flags: <defaults>
</compile_context>

<pallas_src>
import functools

import jax
import jax.numpy as jnp
import numpy as np
from jax.experimental import pallas as pl
from jax.experimental.pallas import tpu as pltpu

# ----------------------------------------------------------------------------
# Small config consistent with the CLIP module's forward
# (original: vocab=49408, d_embed=768, n_tokens=77, heads=12, layers=12).
# ----------------------------------------------------------------------------
N_VOCAB = 100
D_EMBED = 128          # lane-aligned
N_TOKENS = 8
N_HEAD = 4
N_LAYERS = 2
LN_EPS = 1e-5
BATCH = 2

PARAM_KEYS = ("ln1_g", "ln1_b", "wqkv", "bqkv", "wout", "bout",
              "ln2_g", "ln2_b", "w1", "b1", "w2", "b2")


def _layernorm(x, gamma, beta):
    mu = jnp.mean(x, axis=-1, keepdims=True)
    var = jnp.mean((x - mu) ** 2, axis=-1, keepdims=True)
    return (x - mu) * jax.lax.rsqrt(var + LN_EPS) * gamma + beta


# ----------------------------------------------------------------------------
# Pallas kernel: one CLIP transformer layer for a tile of whole sequences.
# ----------------------------------------------------------------------------
def clip_layer_kernel(x_ref, ln1_g_ref, ln1_b_ref, wqkv_ref, bqkv_ref,
                      wout_ref, bout_ref, ln2_g_ref, ln2_b_ref,
                      w1_ref, b1_ref, w2_ref, b2_ref, *rest,
                      n_head, apply_final_ln):
    if apply_final_ln:
        fln_g_ref, fln_b_ref, o_ref = rest
    else:
        (o_ref,) = rest

    nseq, S, D = x_ref.shape
    rows = nseq * S
    dh = D // n_head

    # Flatten (nseq, S, D) -> (nseq*S, D) so every projection sees a tall slab.
    x = x_ref[...].astype(jnp.float32).reshape(rows, D)

    # --- attention branch ----------------------------------------------------
    residue = x
    h = _layernorm(x, ln1_g_ref[0], ln1_b_ref[0])

    qkv = jnp.dot(h.astype(jnp.bfloat16), wqkv_ref[...],
                  preferred_element_type=jnp.float32) + bqkv_ref[0]

    scale = jnp.float32(1.0 / np.sqrt(dh))
    q = qkv[:, :D] * scale            # fold 1/sqrt(dh) into q once
    k = qkv[:, D:2 * D]
    v = qkv[:, 2 * D:]

    # Causal mask as a finite additive bias (safe under any future row padding).
    qi = jax.lax.broadcasted_iota(jnp.int32, (S, S), 0)
    ki = jax.lax.broadcasted_iota(jnp.int32, (S, S), 1)
    mask_bias = jnp.where(ki > qi, jnp.float32(-1e9), jnp.float32(0.0))

    # Accumulate head outputs directly through the output projection.
    attn = jnp.zeros((rows, D), jnp.float32)
    for hidx in range(n_head):                       # static unroll over heads
        sl = slice(hidx * dh, (hidx + 1) * dh)
        qh = q[:, sl].reshape(nseq, S, dh).astype(jnp.bfloat16)
        kh = k[:, sl].reshape(nseq, S, dh).astype(jnp.bfloat16)
        vh = v[:, sl].reshape(nseq, S, dh).astype(jnp.bfloat16)

        s = jnp.einsum("bqd,bkd->bqk", qh, kh,
                       preferred_element_type=jnp.float32)       # (nseq, S, S)
        s = s + mask_bias[None, :, :]
        s = s - jnp.max(s, axis=-1, keepdims=True)
        p = jnp.exp(s)
        p = p * pl.reciprocal(jnp.sum(p, axis=-1, keepdims=True), approx=True)

        oh = jnp.einsum("bqk,bkd->bqd", p.astype(jnp.bfloat16), vh,
                        preferred_element_type=jnp.float32)      # (nseq, S, dh)
        attn = attn + jnp.dot(oh.reshape(rows, dh).astype(jnp.bfloat16),
                              wout_ref[sl, :],
                              preferred_element_type=jnp.float32)

    x = attn + bout_ref[0] + residue

    # --- MLP branch (quick-GELU) ----------------------------------------------
    residue = x
    h = _layernorm(x, ln2_g_ref[0], ln2_b_ref[0])
    h = jnp.dot(h.astype(jnp.bfloat16), w1_ref[...],
                preferred_element_type=jnp.float32) + b1_ref[0]
    h = h * jax.nn.sigmoid(1.702 * h)
    h = jnp.dot(h.astype(jnp.bfloat16), w2_ref[...],
                preferred_element_type=jnp.float32) + b2_ref[0]
    x = h + residue

    if apply_final_ln:                 # fused final LayerNorm (last layer only)
        x = _layernorm(x, fln_g_ref[0], fln_b_ref[0])

    o_ref[...] = x.reshape(nseq, S, D).astype(o_ref.dtype)


# ----------------------------------------------------------------------------
# Pallas wrappers
# ----------------------------------------------------------------------------
def _full_spec(arr):
    # Weight tensors: single full 2D block, identical for every grid step.
    assert arr.ndim == 2
    return pl.BlockSpec(arr.shape, lambda b: (0, 0))


def _seqs_per_block(batch, seq_len, target_rows=256):
    spb = max(1, min(batch, target_rows // max(seq_len, 1)))
    while batch % spb:
        spb -= 1
    return spb


def clip_layer(x, layer_params, n_head, final_ln=None):
    B, S, D = x.shape
    spb = _seqs_per_block(B, S)
    grid = (B // spb,)

    weights = [layer_params[k] for k in PARAM_KEYS]
    extra = list(final_ln) if final_ln is not None else []

    in_specs = [pl.BlockSpec((spb, S, D), lambda b: (b, 0, 0))]
    in_specs += [_full_spec(w) for w in weights + extra]

    kernel = functools.partial(clip_layer_kernel, n_head=n_head,
                               apply_final_ln=final_ln is not None)
    return pl.pallas_call(
        kernel,
        out_shape=jax.ShapeDtypeStruct((B, S, D), x.dtype),
        grid=grid,
        in_specs=in_specs,
        out_specs=pl.BlockSpec((spb, S, D), lambda b: (b, 0, 0)),
        compiler_params=pltpu.CompilerParams(
            dimension_semantics=("parallel",),
            vmem_limit_bytes=32 * 1024 * 1024),
    )(x, *weights, *extra)


def clip_forward(tokens, params):
    # tokens.type(torch.long) -> int indexing
    tokens = tokens.astype(jnp.int32)
    # Embedding lookup + position add (glue; data-dependent gather kept in JAX).
    x = params["tok_emb"][tokens] + params["pos_emb"][None, :, :]
    n_layers = len(params["layers"])
    for i, layer_params in enumerate(params["layers"]):
        final_ln = (params["ln_g"], params["ln_b"]) if i == n_layers - 1 else None
        x = clip_layer(x, layer_params, N_HEAD, final_ln=final_ln)
    return x


# ----------------------------------------------------------------------------
# Pure-JAX reference (same math, no Pallas) for a correctness check
# ----------------------------------------------------------------------------
def clip_reference(tokens, params):
    tokens = tokens.astype(jnp.int32)
    x = params["tok_emb"][tokens] + params["pos_emb"][None, :, :]
    B, S, D = x.shape
    dh = D // N_HEAD
    causal = jnp.triu(jnp.ones((S, S), dtype=bool), k=1)
    for p in params["layers"]:
        res = x
        h = _layernorm(x, p["ln1_g"][0], p["ln1_b"][0])
        qkv = h @ p["wqkv"].astype(jnp.float32) + p["bqkv"][0]
        q, k, v = jnp.split(qkv, 3, axis=-1)
        q = q.reshape(B, S, N_HEAD, dh).transpose(0, 2, 1, 3)
        k = k.reshape(B, S, N_HEAD, dh).transpose(0, 2, 1, 3)
        v = v.reshape(B, S, N_HEAD, dh).transpose(0, 2, 1, 3)
        w = jnp.einsum("bhqd,bhkd->bhqk", q, k)
        w = jnp.where(causal[None, None], -jnp.inf, w) / jnp.sqrt(jnp.float32(dh))
        w = jax.nn.softmax(w, axis=-1)
        o = jnp.einsum("bhqk,bhkd->bhqd", w, v).transpose(0, 2, 1, 3).reshape(B, S, D)
        o = o @ p["wout"].astype(jnp.float32) + p["bout"][0]
        x = o + res
        res = x
        h = _layernorm(x, p["ln2_g"][0], p["ln2_b"][0])
        h = h @ p["w1"].astype(jnp.float32) + p["b1"][0]
        h = h * jax.nn.sigmoid(1.702 * h)
        h = h @ p["w2"].astype(jnp.float32) + p["b2"][0]
        x = h + res
    return _layernorm(x, params["ln_g"][0], params["ln_b"][0])


# ----------------------------------------------------------------------------
# Deterministic parameter initialization (synthetic; shapes follow __init__).
# Linear weights are stored already transposed to (in, out) = nn.Linear.weight.T
# so the kernel does y = x @ W + b.  Matmul weights are stored bf16.
# ----------------------------------------------------------------------------
def init_params(key):
    D = D_EMBED
    counter = iter(range(1 << 20))

    def normal(shape, scale=0.02, dtype=jnp.float32):
        k = jax.random.fold_in(key, next(counter))
        return (scale * jax.random.normal(k, shape)).astype(dtype)

    wdt = jnp.bfloat16
    params = {
        "tok_emb": normal((N_VOCAB, D)),
        "pos_emb": normal((N_TOKENS, D)),
        "ln_g": 1.0 + normal((1, D), scale=0.05),
        "ln_b": normal((1, D), scale=0.05),
        "layers": [],
    }
    for _ in range(N_LAYERS):
        layer = {
            "ln1_g": 1.0 + normal((1, D), scale=0.05),
            "ln1_b": normal((1, D), scale=0.05),
            "wqkv": normal((D, 3 * D), dtype=wdt),
            "bqkv": normal((1, 3 * D)),
            "wout": normal((D, D), dtype=wdt),
            "bout": normal((1, D)),
            "ln2_g": 1.0 + normal((1, D), scale=0.05),
            "ln2_b": normal((1, D), scale=0.05),
            "w1": normal((D, 4 * D), dtype=wdt),
            "b1": normal((1, 4 * D)),
            "w2": normal((4 * D, D), dtype=wdt),
            "b2": normal((1, D)),
        }
        params["layers"].append(layer)
    return params


if __name__ == "__main__":
    key = jax.random.PRNGKey(0)
    key_tok, key_params = jax.random.split(key)

    tokens = jax.random.randint(key_tok, (BATCH, N_TOKENS), 0, N_VOCAB, dtype=jnp.int32)
    params = init_params(key_params)

    out = clip_forward(tokens, params)
    out = jax.block_until_ready(out)

    ref = jax.block_until_ready(clip_reference(tokens, params))
    np.testing.assert_allclose(np.asarray(out), np.asarray(ref), rtol=5e-2, atol=5e-2)

    assert out.shape == (BATCH, N_TOKENS, D_EMBED)
    print("KERNEL_OK")
</pallas_src>

<mosaic_0001>
module attributes {stable_mosaic.version = 11 : i64} {
  func.func @clip_layer_kernel(%arg0: i32, %arg1: memref<2x8x128xf32, #tpu.memory_space<vmem>>, %arg2: memref<1x128xf32, #tpu.memory_space<vmem>>, %arg3: memref<1x128xf32, #tpu.memory_space<vmem>>, %arg4: memref<128x384xbf16, #tpu.memory_space<vmem>>, %arg5: memref<1x384xf32, #tpu.memory_space<vmem>>, %arg6: memref<128x128xbf16, #tpu.memory_space<vmem>>, %arg7: memref<1x128xf32, #tpu.memory_space<vmem>>, %arg8: memref<1x128xf32, #tpu.memory_space<vmem>>, %arg9: memref<1x128xf32, #tpu.memory_space<vmem>>, %arg10: memref<128x512xbf16, #tpu.memory_space<vmem>>, %arg11: memref<1x512xf32, #tpu.memory_space<vmem>>, %arg12: memref<512x128xbf16, #tpu.memory_space<vmem>>, %arg13: memref<1x128xf32, #tpu.memory_space<vmem>>, %arg14: memref<2x8x128xf32, #tpu.memory_space<vmem>>) attributes {dimension_semantics = [#tpu.dimension_semantics<parallel>], iteration_bounds = array<i64: 1>, scalar_prefetch = 0 : i64, scratch_operands = 0 : i64, tpu.core_type = #tpu.core_type<tc>, window_params = [{transform_indices = @transform_0, window_bounds = array<i64: 2, 8, 128>}, {pipeline_mode = #tpu.pipeline_mode<synchronous>, transform_indices = @transform_1, window_bounds = array<i64: 1, 128>}, {pipeline_mode = #tpu.pipeline_mode<synchronous>, transform_indices = @transform_2, window_bounds = array<i64: 1, 128>}, {pipeline_mode = #tpu.pipeline_mode<synchronous>, transform_indices = @transform_3, window_bounds = array<i64: 128, 384>}, {pipeline_mode = #tpu.pipeline_mode<synchronous>, transform_indices = @transform_4, window_bounds = array<i64: 1, 384>}, {pipeline_mode = #tpu.pipeline_mode<synchronous>, transform_indices = @transform_5, window_bounds = array<i64: 128, 128>}, {pipeline_mode = #tpu.pipeline_mode<synchronous>, transform_indices = @transform_6, window_bounds = array<i64: 1, 128>}, {pipeline_mode = #tpu.pipeline_mode<synchronous>, transform_indices = @transform_7, window_bounds = array<i64: 1, 128>}, {pipeline_mode = #tpu.pipeline_mode<synchronous>, transform_indices = @transform_8, window_bounds = array<i64: 1, 128>}, {pipeline_mode = #tpu.pipeline_mode<synchronous>, transform_indices = @transform_9, window_bounds = array<i64: 128, 512>}, {pipeline_mode = #tpu.pipeline_mode<synchronous>, transform_indices = @transform_10, window_bounds = array<i64: 1, 512>}, {pipeline_mode = #tpu.pipeline_mode<synchronous>, transform_indices = @transform_11, window_bounds = array<i64: 512, 128>}, {pipeline_mode = #tpu.pipeline_mode<synchronous>, transform_indices = @transform_12, window_bounds = array<i64: 1, 128>}, {transform_indices = @transform_13, window_bounds = array<i64: 2, 8, 128>}]} {
    %c0 = arith.constant 0 : index
    %c0_0 = arith.constant 0 : index
    %c0_1 = arith.constant 0 : index
    %0 = vector.load %arg1[%c0, %c0_0, %c0_1] : memref<2x8x128xf32, #tpu.memory_space<vmem>>, vector<2x8x128xf32>
    %1 = vector.shape_cast %0 : vector<2x8x128xf32> to vector<16x128xf32>
    %c0_2 = arith.constant 0 : index
    %c0_3 = arith.constant 0 : index
    %2 = vector.load %arg2[%c0_2, %c0_3] : memref<1x128xf32, #tpu.memory_space<vmem>>, vector<1x128xf32>
    %3 = vector.shape_cast %2 : vector<1x128xf32> to vector<128xf32>
    %c0_4 = arith.constant 0 : index
    %c0_5 = arith.constant 0 : index
    %4 = vector.load %arg3[%c0_4, %c0_5] : memref<1x128xf32, #tpu.memory_space<vmem>>, vector<1x128xf32>
    %5 = vector.shape_cast %4 : vector<1x128xf32> to vector<128xf32>
    %cst = arith.constant dense<0.000000e+00> : vector<16xf32>
    %6 = vector.multi_reduction <add>, %1, %cst [1] : vector<16x128xf32> to vector<16xf32>
    %7 = vector.shape_cast %6 : vector<16xf32> to vector<16x1xf32>
    %cst_6 = arith.constant 1.280000e+02 : f32
    %8 = vector.broadcast %cst_6 : f32 to vector<16x1xf32>
    %9 = arith.divf %7, %8 : vector<16x1xf32>
    %10 = vector.broadcast %9 : vector<16x1xf32> to vector<16x128xf32>
    %11 = arith.subf %1, %10 : vector<16x128xf32>
    %12 = arith.mulf %11, %11 : vector<16x128xf32>
    %cst_7 = arith.constant dense<0.000000e+00> : vector<16xf32>
    %13 = vector.multi_reduction <add>, %12, %cst_7 [1] : vector<16x128xf32> to vector<16xf32>
    %14 = vector.shape_cast %13 : vector<16xf32> to vector<16x1xf32>
    %cst_8 = arith.constant 1.280000e+02 : f32
    %15 = vector.broadcast %cst_8 : f32 to vector<16x1xf32>
    %16 = arith.divf %14, %15 : vector<16x1xf32>
    %17 = vector.broadcast %9 : vector<16x1xf32> to vector<16x128xf32>
    %18 = arith.subf %1, %17 : vector<16x128xf32>
    %cst_9 = arith.constant 9.99999974E-6 : f32
    %19 = vector.broadcast %cst_9 : f32 to vector<16x1xf32>
    %20 = arith.addf %16, %19 : vector<16x1xf32>
    %21 = math.rsqrt %20 : vector<16x1xf32>
    %22 = vector.broadcast %21 : vector<16x1xf32> to vector<16x128xf32>
    %23 = arith.mulf %18, %22 : vector<16x128xf32>
    %24 = vector.shape_cast %3 : vector<128xf32> to vector<1x128xf32>
    %25 = vector.broadcast %24 : vector<1x128xf32> to vector<16x128xf32>
    %26 = arith.mulf %23, %25 : vector<16x128xf32>
    %27 = vector.shape_cast %5 : vector<128xf32> to vector<1x128xf32>
    %28 = vector.broadcast %27 : vector<1x128xf32> to vector<16x128xf32>
    %29 = arith.addf %26, %28 : vector<16x128xf32>
    %30 = arith.truncf %29 : vector<16x128xf32> to vector<16x128xbf16>
    %c0_10 = arith.constant 0 : index
    %c0_11 = arith.constant 0 : index
    %31 = vector.load %arg4[%c0_10, %c0_11] : memref<128x384xbf16, #tpu.memory_space<vmem>>, vector<128x384xbf16>
    %cst_12 = arith.constant dense<0.000000e+00> : vector<16x384xf32>
    %32 = tpu.matmul %30, %31, %cst_12 {dimension_numbers = #tpu.dot_dimension_numbers<[1], [0], [0], [1], [0, 0, 1, 1], [], []>} : vector<16x128xbf16>, vector<128x384xbf16>, vector<16x384xf32> -> vector<16x384xf32>
    %c0_13 = arith.constant 0 : index
    %c0_14 = arith.constant 0 : index
    %33 = vector.load %arg5[%c0_13, %c0_14] : memref<1x384xf32, #tpu.memory_space<vmem>>, vector<1x384xf32>
    %34 = vector.shape_cast %33 : vector<1x384xf32> to vector<384xf32>
    %35 = vector.shape_cast %34 : vector<384xf32> to vector<1x384xf32>
    %36 = vector.broadcast %35 : vector<1x384xf32> to vector<16x384xf32>
    %37 = arith.addf %32, %36 : vector<16x384xf32>
    %38 = vector.extract_strided_slice %37 {offsets = [0, 0], sizes = [16, 128], strides = [1, 1]} : vector<16x384xf32> to vector<16x128xf32>
    %cst_15 = arith.constant 0.176776692 : f32
    %39 = vector.broadcast %cst_15 : f32 to vector<16x128xf32>
    %40 = arith.mulf %38, %39 : vector<16x128xf32>
    %41 = vector.extract_strided_slice %37 {offsets = [0, 128], sizes = [16, 128], strides = [1, 1]} : vector<16x384xf32> to vector<16x128xf32>
    %42 = vector.extract_strided_slice %37 {offsets = [0, 256], sizes = [16, 128], strides = [1, 1]} : vector<16x384xf32> to vector<16x128xf32>
    %43 = tpu.iota {dimensions = array<i32: 0>} : vector<8x8xi32>
    %44 = tpu.iota {dimensions = array<i32: 1>} : vector<8x8xi32>
    %45 = arith.cmpi sgt, %44, %43 : vector<8x8xi32>
    %cst_16 = arith.constant -1.000000e+09 : f32
    %cst_17 = arith.constant 0.000000e+00 : f32
    %46 = vector.broadcast %cst_16 : f32 to vector<8x8xf32>
    %47 = vector.broadcast %cst_17 : f32 to vector<8x8xf32>
    %48 = arith.select %45, %46, %47 : vector<8x8xi1>, vector<8x8xf32>
    %cst_18 = arith.constant 0.000000e+00 : f32
    %49 = vector.broadcast %cst_18 : f32 to vector<16x128xf32>
    %50 = vector.extract_strided_slice %40 {offsets = [0, 0], sizes = [16, 32], strides = [1, 1]} : vector<16x128xf32> to vector<16x32xf32>
    %51 = vector.shape_cast %50 : vector<16x32xf32> to vector<2x8x32xf32>
    %52 = arith.truncf %51 : vector<2x8x32xf32> to vector<2x8x32xbf16>
    %53 = vector.extract_strided_slice %41 {offsets = [0, 0], sizes = [16, 32], strides = [1, 1]} : vector<16x128xf32> to vector<16x32xf32>
    %54 = vector.shape_cast %53 : vector<16x32xf32> to vector<2x8x32xf32>
    %55 = arith.truncf %54 : vector<2x8x32xf32> to vector<2x8x32xbf16>
    %56 = vector.extract_strided_slice %42 {offsets = [0, 0], sizes = [16, 32], strides = [1, 1]} : vector<16x128xf32> to vector<16x32xf32>
    %57 = vector.shape_cast %56 : vector<16x32xf32> to vector<2x8x32xf32>
    %58 = arith.truncf %57 : vector<2x8x32xf32> to vector<2x8x32xbf16>
    "tpu.trace_start"() <{level = 10 : i32, message = "bqd,bkd->bqk"}> : () -> ()
    %cst_19 = arith.constant dense<0.000000e+00> : vector<2x8x8xf32>
    %59 = tpu.matmul %52, %55, %cst_19 {dimension_numbers = #tpu.dot_dimension_numbers<[2], [2], [1], [1], [0, 0, 0, 1, 1, 1], [0], [0]>} : vector<2x8x32xbf16>, vector<2x8x32xbf16>, vector<2x8x8xf32> -> vector<2x8x8xf32>
    "tpu.trace_stop"() : () -> ()
    %60 = vector.shape_cast %48 : vector<8x8xf32> to vector<1x8x8xf32>
    %61 = vector.broadcast %60 : vector<1x8x8xf32> to vector<2x8x8xf32>
    %62 = arith.addf %59, %61 : vector<2x8x8xf32>
    %cst_20 = arith.constant dense<0xFF800000> : vector<2x8xf32>
    %63 = vector.multi_reduction <maximumf>, %62, %cst_20 [2] : vector<2x8x8xf32> to vector<2x8xf32>
    %64 = vector.shape_cast %63 : vector<2x8xf32> to vector<2x8x1xf32>
    %65 = vector.broadcast %64 : vector<2x8x1xf32> to vector<2x8x8xf32>
    %66 = arith.subf %62, %65 : vector<2x8x8xf32>
    %67 = math.exp %66 : vector<2x8x8xf32>
    %cst_21 = arith.constant dense<0.000000e+00> : vector<2x8xf32>
    %68 = vector.multi_reduction <add>, %67, %cst_21 [2] : vector<2x8x8xf32> to vector<2x8xf32>
    %69 = vector.shape_cast %68 : vector<2x8xf32> to vector<2x8x1xf32>
    %70 = tpu.reciprocal %69 {approx = true} : vector<2x8x1xf32> -> vector<2x8x1xf32>
    %71 = vector.broadcast %70 : vector<2x8x1xf32> to vector<2x8x8xf32>
    %72 = arith.mulf %67, %71 : vector<2x8x8xf32>
    %73 = arith.truncf %72 : vector<2x8x8xf32> to vector<2x8x8xbf16>
    "tpu.trace_start"() <{level = 10 : i32, message = "bqk,bkd->bqd"}> : () -> ()
    %cst_22 = arith.constant dense<0.000000e+00> : vector<2x8x32xf32>
    %74 = tpu.matmul %73, %58, %cst_22 {dimension_numbers = #tpu.dot_dimension_numbers<[2], [1], [1], [2], [0, 0, 0, 1, 1, 2], [0], [0]>} : vector<2x8x8xbf16>, vector<2x8x32xbf16>, vector<2x8x32xf32> -> vector<2x8x32xf32>
    "tpu.trace_stop"() : () -> ()
    %75 = vector.shape_cast %74 : vector<2x8x32xf32> to vector<16x32xf32>
    %76 = arith.truncf %75 : vector<16x32xf32> to vector<16x32xbf16>
    %c0_23 = arith.constant 0 : index
    %c0_24 = arith.constant 0 : index
    %77 = vector.load %arg6[%c0_23, %c0_24] : memref<128x128xbf16, #tpu.memory_space<vmem>>, vector<32x128xbf16>
    %cst_25 = arith.constant dense<0.000000e+00> : vector<16x128xf32>
    %78 = tpu.matmul %76, %77, %cst_25 {dimension_numbers = #tpu.dot_dimension_numbers<[1], [0], [0], [1], [0, 0, 1, 1], [], []>} : vector<16x32xbf16>, vector<32x128xbf16>, vector<16x128xf32> -> vector<16x128xf32>
    %79 = arith.addf %49, %78 : vector<16x128xf32>
    %80 = vector.extract_strided_slice %40 {offsets = [0, 32], sizes = [16, 32], strides = [1, 1]} : vector<16x128xf32> to vector<16x32xf32>
    %81 = vector.shape_cast %80 : vector<16x32xf32> to vector<2x8x32xf32>
    %82 = arith.truncf %81 : vector<2x8x32xf32> to vector<2x8x32xbf16>
    %83 = vector.extract_strided_slice %41 {offsets = [0, 32], sizes = [16, 32], strides = [1, 1]} : vector<16x128xf32> to vector<16x32xf32>
    %84 = vector.shape_cast %83 : vector<16x32xf32> to vector<2x8x32xf32>
    %85 = arith.truncf %84 : vector<2x8x32xf32> to vector<2x8x32xbf16>
    %86 = vector.extract_strided_slice %42 {offsets = [0, 32], sizes = [16, 32], strides = [1, 1]} : vector<16x128xf32> to vector<16x32xf32>
    %87 = vector.shape_cast %86 : vector<16x32xf32> to vector<2x8x32xf32>
    %88 = arith.truncf %87 : vector<2x8x32xf32> to vector<2x8x32xbf16>
    "tpu.trace_start"() <{level = 10 : i32, message = "bqd,bkd->bqk"}> : () -> ()
    %cst_26 = arith.constant dense<0.000000e+00> : vector<2x8x8xf32>
    %89 = tpu.matmul %82, %85, %cst_26 {dimension_numbers = #tpu.dot_dimension_numbers<[2], [2], [1], [1], [0, 0, 0, 1, 1, 1], [0], [0]>} : vector<2x8x32xbf16>, vector<2x8x32xbf16>, vector<2x8x8xf32> -> vector<2x8x8xf32>
    "tpu.trace_stop"() : () -> ()
    %90 = vector.shape_cast %48 : vector<8x8xf32> to vector<1x8x8xf32>
    %91 = vector.broadcast %90 : vector<1x8x8xf32> to vector<2x8x8xf32>
    %92 = arith.addf %89, %91 : vector<2x8x8xf32>
    %cst_27 = arith.constant dense<0xFF800000> : vector<2x8xf32>
    %93 = vector.multi_reduction <maximumf>, %92, %cst_27 [2] : vector<2x8x8xf32> to vector<2x8xf32>
    %94 = vector.shape_cast %93 : vector<2x8xf32> to vector<2x8x1xf32>
    %95 = vector.broadcast %94 : vector<2x8x1xf32> to vector<2x8x8xf32>
    %96 = arith.subf %92, %95 : vector<2x8x8xf32>
    %97 = math.exp %96 : vector<2x8x8xf32>
    %cst_28 = arith.constant dense<0.000000e+00> : vector<2x8xf32>
    %98 = vector.multi_reduction <add>, %97, %cst_28 [2] : vector<2x8x8xf32> to vector<2x8xf32>
    %99 = vector.shape_cast %98 : vector<2x8xf32> to vector<2x8x1xf32>
    %100 = tpu.reciprocal %99 {approx = true} : vector<2x8x1xf32> -> vector<2x8x1xf32>
    %101 = vector.broadcast %100 : vector<2x8x1xf32> to vector<2x8x8xf32>
    %102 = arith.mulf %97, %101 : vector<2x8x8xf32>
    %103 = arith.truncf %102 : vector<2x8x8xf32> to vector<2x8x8xbf16>
    "tpu.trace_start"() <{level = 10 : i32, message = "bqk,bkd->bqd"}> : () -> ()
    %cst_29 = arith.constant dense<0.000000e+00> : vector<2x8x32xf32>
    %104 = tpu.matmul %103, %88, %cst_29 {dimension_numbers = #tpu.dot_dimension_numbers<[2], [1], [1], [2], [0, 0, 0, 1, 1, 2], [0], [0]>} : vector<2x8x8xbf16>, vector<2x8x32xbf16>, vector<2x8x32xf32> -> vector<2x8x32xf32>
    "tpu.trace_stop"() : () -> ()
    %105 = vector.shape_cast %104 : vector<2x8x32xf32> to vector<16x32xf32>
    %106 = arith.truncf %105 : vector<16x32xf32> to vector<16x32xbf16>
    %c32 = arith.constant 32 : index
    %c0_30 = arith.constant 0 : index
    %107 = vector.load %arg6[%c32, %c0_30] : memref<128x128xbf16, #tpu.memory_space<vmem>>, vector<32x128xbf16>
    %cst_31 = arith.constant dense<0.000000e+00> : vector<16x128xf32>
    %108 = tpu.matmul %106, %107, %cst_31 {dimension_numbers = #tpu.dot_dimension_numbers<[1], [0], [0], [1], [0, 0, 1, 1], [], []>} : vector<16x32xbf16>, vector<32x128xbf16>, vector<16x128xf32> -> vector<16x128xf32>
    %109 = arith.addf %79, %108 : vector<16x128xf32>
    %110 = vector.extract_strided_slice %40 {offsets = [0, 64], sizes = [16, 32], strides = [1, 1]} : vector<16x128xf32> to vector<16x32xf32>
    %111 = vector.shape_cast %110 : vector<16x32xf32> to vector<2x8x32xf32>
    %112 = arith.truncf %111 : vector<2x8x32xf32> to vector<2x8x32xbf16>
    %113 = vector.extract_strided_slice %41 {offsets = [0, 64], sizes = [16, 32], strides = [1, 1]} : vector<16x128xf32> to vector<16x32xf32>
    %114 = vector.shape_cast %113 : vector<16x32xf32> to vector<2x8x32xf32>
    %115 = arith.truncf %114 : vector<2x8x32xf32> to vector<2x8x32xbf16>
    %116 = vector.extract_strided_slice %42 {offsets = [0, 64], sizes = [16, 32], strides = [1, 1]} : vector<16x128xf32> to vector<16x32xf32>
    %117 = vector.shape_cast %116 : vector<16x32xf32> to vector<2x8x32xf32>
    %118 = arith.truncf %117 : vector<2x8x32xf32> to vector<2x8x32xbf16>
    "tpu.trace_start"() <{level = 10 : i32, message = "bqd,bkd->bqk"}> : () -> ()
    %cst_32 = arith.constant dense<0.000000e+00> : vector<2x8x8xf32>
    %119 = tpu.matmul %112, %115, %cst_32 {dimension_numbers = #tpu.dot_dimension_numbers<[2], [2], [1], [1], [0, 0, 0, 1, 1, 1], [0], [0]>} : vector<2x8x32xbf16>, vector<2x8x32xbf16>, vector<2x8x8xf32> -> vector<2x8x8xf32>
    "tpu.trace_stop"() : () -> ()
    %120 = vector.shape_cast %48 : vector<8x8xf32> to vector<1x8x8xf32>
    %121 = vector.broadcast %120 : vector<1x8x8xf32> to vector<2x8x8xf32>
    %122 = arith.addf %119, %121 : vector<2x8x8xf32>
    %cst_33 = arith.constant dense<0xFF800000> : vector<2x8xf32>
    %123 = vector.multi_reduction <maximumf>, %122, %cst_33 [2] : vector<2x8x8xf32> to vector<2x8xf32>
    %124 = vector.shape_cast %123 : vector<2x8xf32> to vector<2x8x1xf32>
    %125 = vector.broadcast %124 : vector<2x8x1xf32> to vector<2x8x8xf32>
    %126 = arith.subf %122, %125 : vector<2x8x8xf32>
    %127 = math.exp %126 : vector<2x8x8xf32>
    %cst_34 = arith.constant dense<0.000000e+00> : vector<2x8xf32>
    %128 = vector.multi_reduction <add>, %127, %cst_34 [2] : vector<2x8x8xf32> to vector<2x8xf32>
    %129 = vector.shape_cast %128 : vector<2x8xf32> to vector<2x8x1xf32>
    %130 = tpu.reciprocal %129 {approx = true} : vector<2x8x1xf32> -> vector<2x8x1xf32>
    %131 = vector.broadcast %130 : vector<2x8x1xf32> to vector<2x8x8xf32>
    %132 = arith.mulf %127, %131 : vector<2x8x8xf32>
    %133 = arith.truncf %132 : vector<2x8x8xf32> to vector<2x8x8xbf16>
    "tpu.trace_start"() <{level = 10 : i32, message = "bqk,bkd->bqd"}> : () -> ()
    %cst_35 = arith.constant dense<0.000000e+00> : vector<2x8x32xf32>
    %134 = tpu.matmul %133, %118, %cst_35 {dimension_numbers = #tpu.dot_dimension_numbers<[2], [1], [1], [2], [0, 0, 0, 1, 1, 2], [0], [0]>} : vector<2x8x8xbf16>, vector<2x8x32xbf16>, vector<2x8x32xf32> -> vector<2x8x32xf32>
    "tpu.trace_stop"() : () -> ()
    %135 = vector.shape_cast %134 : vector<2x8x32xf32> to vector<16x32xf32>
    %136 = arith.truncf %135 : vector<16x32xf32> to vector<16x32xbf16>
    %c64 = arith.constant 64 : index
    %c0_36 = arith.constant 0 : index
    %137 = vector.load %arg6[%c64, %c0_36] : memref<128x128xbf16, #tpu.memory_space<vmem>>, vector<32x128xbf16>
    %cst_37 = arith.constant dense<0.000000e+00> : vector<16x128xf32>
    %138 = tpu.matmul %136, %137, %cst_37 {dimension_numbers = #tpu.dot_dimension_numbers<[1], [0], [0], [1], [0, 0, 1, 1], [], []>} : vector<16x32xbf16>, vector<32x128xbf16>, vector<16x128xf32> -> vector<16x128xf32>
    %139 = arith.addf %109, %138 : vector<16x128xf32>
    %140 = vector.extract_strided_slice %40 {offsets = [0, 96], sizes = [16, 32], strides = [1, 1]} : vector<16x128xf32> to vector<16x32xf32>
    %141 = vector.shape_cast %140 : vector<16x32xf32> to vector<2x8x32xf32>
    %142 = arith.truncf %141 : vector<2x8x32xf32> to vector<2x8x32xbf16>
    %143 = vector.extract_strided_slice %41 {offsets = [0, 96], sizes = [16, 32], strides = [1, 1]} : vector<16x128xf32> to vector<16x32xf32>
    %144 = vector.shape_cast %143 : vector<16x32xf32> to vector<2x8x32xf32>
    %145 = arith.truncf %144 : vector<2x8x32xf32> to vector<2x8x32xbf16>
    %146 = vector.extract_strided_slice %42 {offsets = [0, 96], sizes = [16, 32], strides = [1, 1]} : vector<16x128xf32> to vector<16x32xf32>
    %147 = vector.shape_cast %146 : vector<16x32xf32> to vector<2x8x32xf32>
    %148 = arith.truncf %147 : vector<2x8x32xf32> to vector<2x8x32xbf16>
    "tpu.trace_start"() <{level = 10 : i32, message = "bqd,bkd->bqk"}> : () -> ()
    %cst_38 = arith.constant dense<0.000000e+00> : vector<2x8x8xf32>
    %149 = tpu.matmul %142, %145, %cst_38 {dimension_numbers = #tpu.dot_dimension_numbers<[2], [2], [1], [1], [0, 0, 0, 1, 1, 1], [0], [0]>} : vector<2x8x32xbf16>, vector<2x8x32xbf16>, vector<2x8x8xf32> -> vector<2x8x8xf32>
    "tpu.trace_stop"() : () -> ()
    %150 = vector.shape_cast %48 : vector<8x8xf32> to vector<1x8x8xf32>
    %151 = vector.broadcast %150 : vector<1x8x8xf32> to vector<2x8x8xf32>
    %152 = arith.addf %149, %151 : vector<2x8x8xf32>
    %cst_39 = arith.constant dense<0xFF800000> : vector<2x8xf32>
    %153 = vector.multi_reduction <maximumf>, %152, %cst_39 [2] : vector<2x8x8xf32> to vector<2x8xf32>
    %154 = vector.shape_cast %153 : vector<2x8xf32> to vector<2x8x1xf32>
    %155 = vector.broadcast %154 : vector<2x8x1xf32> to vector<2x8x8xf32>
    %156 = arith.subf %152, %155 : vector<2x8x8xf32>
    %157 = math.exp %156 : vector<2x8x8xf32>
    %cst_40 = arith.constant dense<0.000000e+00> : vector<2x8xf32>
    %158 = vector.multi_reduction <add>, %157, %cst_40 [2] : vector<2x8x8xf32> to vector<2x8xf32>
    %159 = vector.shape_cast %158 : vector<2x8xf32> to vector<2x8x1xf32>
    %160 = tpu.reciprocal %159 {approx = true} : vector<2x8x1xf32> -> vector<2x8x1xf32>
    %161 = vector.broadcast %160 : vector<2x8x1xf32> to vector<2x8x8xf32>
    %162 = arith.mulf %157, %161 : vector<2x8x8xf32>
    %163 = arith.truncf %162 : vector<2x8x8xf32> to vector<2x8x8xbf16>
    "tpu.trace_start"() <{level = 10 : i32, message = "bqk,bkd->bqd"}> : () -> ()
    %cst_41 = arith.constant dense<0.000000e+00> : vector<2x8x32xf32>
    %164 = tpu.matmul %163, %148, %cst_41 {dimension_numbers = #tpu.dot_dimension_numbers<[2], [1], [1], [2], [0, 0, 0, 1, 1, 2], [0], [0]>} : vector<2x8x8xbf16>, vector<2x8x32xbf16>, vector<2x8x32xf32> -> vector<2x8x32xf32>
    "tpu.trace_stop"() : () -> ()
    %165 = vector.shape_cast %164 : vector<2x8x32xf32> to vector<16x32xf32>
    %166 = arith.truncf %165 : vector<16x32xf32> to vector<16x32xbf16>
    %c96 = arith.constant 96 : index
    %c0_42 = arith.constant 0 : index
    %167 = vector.load %arg6[%c96, %c0_42] : memref<128x128xbf16, #tpu.memory_space<vmem>>, vector<32x128xbf16>
    %cst_43 = arith.constant dense<0.000000e+00> : vector<16x128xf32>
    %168 = tpu.matmul %166, %167, %cst_43 {dimension_numbers = #tpu.dot_dimension_numbers<[1], [0], [0], [1], [0, 0, 1, 1], [], []>} : vector<16x32xbf16>, vector<32x128xbf16>, vector<16x128xf32> -> vector<16x128xf32>
    %169 = arith.addf %139, %168 : vector<16x128xf32>
    %c0_44 = arith.constant 0 : index
    %c0_45 = arith.constant 0 : index
    %170 = vector.load %arg7[%c0_44, %c0_45] : memref<1x128xf32, #tpu.memory_space<vmem>>, vector<1x128xf32>
    %171 = vector.shape_cast %170 : vector<1x128xf32> to vector<128xf32>
    %172 = vector.shape_cast %171 : vector<128xf32> to vector<1x128xf32>
    %173 = vector.broadcast %172 : vector<1x128xf32> to vector<16x128xf32>
    %174 = arith.addf %169, %173 : vector<16x128xf32>
    %175 = arith.addf %174, %1 : vector<16x128xf32>
    %c0_46 = arith.constant 0 : index
    %c0_47 = arith.constant 0 : index
    %176 = vector.load %arg8[%c0_46, %c0_47] : memref<1x128xf32, #tpu.memory_space<vmem>>, vector<1x128xf32>
    %177 = vector.shape_cast %176 : vector<1x128xf32> to vector<128xf32>
    %c0_48 = arith.constant 0 : index
    %c0_49 = arith.constant 0 : index
    %178 = vector.load %arg9[%c0_48, %c0_49] : memref<1x128xf32, #tpu.memory_space<vmem>>, vector<1x128xf32>
    %179 = vector.shape_cast %178 : vector<1x128xf32> to vector<128xf32>
    %cst_50 = arith.constant dense<0.000000e+00> : vector<16xf32>
    %180 = vector.multi_reduction <add>, %175, %cst_50 [1] : vector<16x128xf32> to vector<16xf32>
    %181 = vector.shape_cast %180 : vector<16xf32> to vector<16x1xf32>
    %cst_51 = arith.constant 1.280000e+02 : f32
    %182 = vector.broadcast %cst_51 : f32 to vector<16x1xf32>
    %183 = arith.divf %181, %182 : vector<16x1xf32>
    %184 = vector.broadcast %183 : vector<16x1xf32> to vector<16x128xf32>
    %185 = arith.subf %175, %184 : vector<16x128xf32>
    %186 = arith.mulf %185, %185 : vector<16x128xf32>
    %cst_52 = arith.constant dense<0.000000e+00> : vector<16xf32>
    %187 = vector.multi_reduction <add>, %186, %cst_52 [1] : vector<16x128xf32> to vector<16xf32>
    %188 = vector.shape_cast %187 : vector<16xf32> to vector<16x1xf32>
    %cst_53 = arith.constant 1.280000e+02 : f32
    %189 = vector.broadcast %cst_53 : f32 to vector<16x1xf32>
    %190 = arith.divf %188, %189 : vector<16x1xf32>
    %191 = vector.broadcast %183 : vector<16x1xf32> to vector<16x128xf32>
    %192 = arith.subf %175, %191 : vector<16x128xf32>
    %cst_54 = arith.constant 9.99999974E-6 : f32
    %193 = vector.broadcast %cst_54 : f32 to vector<16x1xf32>
    %194 = arith.addf %190, %193 : vector<16x1xf32>
    %195 = math.rsqrt %194 : vector<16x1xf32>
    %196 = vector.broadcast %195 : vector<16x1xf32> to vector<16x128xf32>
    %197 = arith.mulf %192, %196 : vector<16x128xf32>
    %198 = vector.shape_cast %177 : vector<128xf32> to vector<1x128xf32>
    %199 = vector.broadcast %198 : vector<1x128xf32> to vector<16x128xf32>
    %200 = arith.mulf %197, %199 : vector<16x128xf32>
    %201 = vector.shape_cast %179 : vector<128xf32> to vector<1x128xf32>
    %202 = vector.broadcast %201 : vector<1x128xf32> to vector<16x128xf32>
    %203 = arith.addf %200, %202 : vector<16x128xf32>
    %204 = arith.truncf %203 : vector<16x128xf32> to vector<16x128xbf16>
    %c0_55 = arith.constant 0 : index
    %c0_56 = arith.constant 0 : index
    %205 = vector.load %arg10[%c0_55, %c0_56] : memref<128x512xbf16, #tpu.memory_space<vmem>>, vector<128x512xbf16>
    %cst_57 = arith.constant dense<0.000000e+00> : vector<16x512xf32>
    %206 = tpu.matmul %204, %205, %cst_57 {dimension_numbers = #tpu.dot_dimension_numbers<[1], [0], [0], [1], [0, 0, 1, 1], [], []>} : vector<16x128xbf16>, vector<128x512xbf16>, vector<16x512xf32> -> vector<16x512xf32>
    %c0_58 = arith.constant 0 : index
    %c0_59 = arith.constant 0 : index
    %207 = vector.load %arg11[%c0_58, %c0_59] : memref<1x512xf32, #tpu.memory_space<vmem>>, vector<1x512xf32>
    %208 = vector.shape_cast %207 : vector<1x512xf32> to vector<512xf32>
    %209 = vector.shape_cast %208 : vector<512xf32> to vector<1x512xf32>
    %210 = vector.broadcast %209 : vector<1x512xf32> to vector<16x512xf32>
    %211 = arith.addf %206, %210 : vector<16x512xf32>
    %cst_60 = arith.constant 1.702000e+00 : f32
    %212 = vector.broadcast %cst_60 : f32 to vector<16x512xf32>
    %213 = arith.mulf %212, %211 : vector<16x512xf32>
    %214 = arith.negf %213 : vector<16x512xf32>
    %215 = math.exp %214 : vector<16x512xf32>
    %cst_61 = arith.constant 1.000000e+00 : f32
    %216 = vector.broadcast %cst_61 : f32 to vector<16x512xf32>
    %217 = arith.addf %216, %215 : vector<16x512xf32>
    %218 = arith.divf %216, %217 : vector<16x512xf32>
    %219 = arith.mulf %211, %218 : vector<16x512xf32>
    %220 = arith.truncf %219 : vector<16x512xf32> to vector<16x512xbf16>
    %c0_62 = arith.constant 0 : index
    %c0_63 = arith.constant 0 : index
    %221 = vector.load %arg12[%c0_62, %c0_63] : memref<512x128xbf16, #tpu.memory_space<vmem>>, vector<512x128xbf16>
    %cst_64 = arith.constant dense<0.000000e+00> : vector<16x128xf32>
    %222 = tpu.matmul %220, %221, %cst_64 {dimension_numbers = #tpu.dot_dimension_numbers<[1], [0], [0], [1], [0, 0, 1, 1], [], []>} : vector<16x512xbf16>, vector<512x128xbf16>, vector<16x128xf32> -> vector<16x128xf32>
    %c0_65 = arith.constant 0 : index
    %c0_66 = arith.constant 0 : index
    %223 = vector.load %arg13[%c0_65, %c0_66] : memref<1x128xf32, #tpu.memory_space<vmem>>, vector<1x128xf32>
    %224 = vector.shape_cast %223 : vector<1x128xf32> to vector<128xf32>
    %225 = vector.shape_cast %224 : vector<128xf32> to vector<1x128xf32>
    %226 = vector.broadcast %225 : vector<1x128xf32> to vector<16x128xf32>
    %227 = arith.addf %222, %226 : vector<16x128xf32>
    %228 = arith.addf %227, %175 : vector<16x128xf32>
    %229 = vector.shape_cast %228 : vector<16x128xf32> to vector<2x8x128xf32>
    %c0_67 = arith.constant 0 : index
    %c0_68 = arith.constant 0 : index
    %c0_69 = arith.constant 0 : index
    %230 = vector.load %arg14[%c0_67, %c0_68, %c0_69] : memref<2x8x128xf32, #tpu.memory_space<vmem>>, vector<2x8x128xf32>
    tpu.vector_store %arg14[%c0_67, %c0_68, %c0_69], %229 {strides = array<i32>} : memref<2x8x128xf32, #tpu.memory_space<vmem>>, vector<2x8x128xf32>,
    return
  }
  func.func @transform_0(%arg0: i32) -> (i32, i32, i32) {
    %c0_i32 = arith.constant 0 : i32
    %c0_i32_0 = arith.constant 0 : i32
    %c0_i32_1 = arith.constant 0 : i32
    return %arg0, %c0_i32, %c0_i32_0 : i32, i32, i32
  }
  func.func @transform_1(%arg0: i32) -> (i32, i32) {
    %c0_i32 = arith.constant 0 : i32
    %c0_i32_0 = arith.constant 0 : i32
    %c0_i32_1 = arith.constant 0 : i32
    return %c0_i32, %c0_i32_0 : i32, i32
  }
  func.func @transform_2(%arg0: i32) -> (i32, i32) {
    %c0_i32 = arith.constant 0 : i32
    %c0_i32_0 = arith.constant 0 : i32
    %c0_i32_1 = arith.constant 0 : i32
    return %c0_i32, %c0_i32_0 : i32, i32
  }
  func.func @transform_3(%arg0: i32) -> (i32, i32) {
    %c0_i32 = arith.constant 0 : i32
    %c0_i32_0 = arith.constant 0 : i32
    %c0_i32_1 = arith.constant 0 : i32
    return %c0_i32, %c0_i32_0 : i32, i32
  }
  func.func @transform_4(%arg0: i32) -> (i32, i32) {
    %c0_i32 = arith.constant 0 : i32
    %c0_i32_0 = arith.constant 0 : i32
    %c0_i32_1 = arith.constant 0 : i32
    return %c0_i32, %c0_i32_0 : i32, i32
  }
  func.func @transform_5(%arg0: i32) -> (i32, i32) {
    %c0_i32 = arith.constant 0 : i32
    %c0_i32_0 = arith.constant 0 : i32
    %c0_i32_1 = arith.constant 0 : i32
    return %c0_i32, %c0_i32_0 : i32, i32
  }
  func.func @transform_6(%arg0: i32) -> (i32, i32) {
    %c0_i32 = arith.constant 0 : i32
    %c0_i32_0 = arith.constant 0 : i32
    %c0_i32_1 = arith.constant 0 : i32
    return %c0_i32, %c0_i32_0 : i32, i32
  }
  func.func @transform_7(%arg0: i32) -> (i32, i32) {
    %c0_i32 = arith.constant 0 : i32
    %c0_i32_0 = arith.constant 0 : i32
    %c0_i32_1 = arith.constant 0 : i32
    return %c0_i32, %c0_i32_0 : i32, i32
  }
  func.func @transform_8(%arg0: i32) -> (i32, i32) {
    %c0_i32 = arith.constant 0 : i32
    %c0_i32_0 = arith.constant 0 : i32
    %c0_i32_1 = arith.constant 0 : i32
    return %c0_i32, %c0_i32_0 : i32, i32
  }
  func.func @transform_9(%arg0: i32) -> (i32, i32) {
    %c0_i32 = arith.constant 0 : i32
    %c0_i32_0 = arith.constant 0 : i32
    %c0_i32_1 = arith.constant 0 : i32
    return %c0_i32, %c0_i32_0 : i32, i32
  }
  func.func @transform_10(%arg0: i32) -> (i32, i32) {
    %c0_i32 = arith.constant 0 : i32
    %c0_i32_0 = arith.constant 0 : i32
    %c0_i32_1 = arith.constant 0 : i32
    return %c0_i32, %c0_i32_0 : i32, i32
  }
  func.func @transform_11(%arg0: i32) -> (i32, i32) {
    %c0_i32 = arith.constant 0 : i32
    %c0_i32_0 = arith.constant 0 : i32
    %c0_i32_1 = arith.constant 0 : i32
    return %c0_i32, %c0_i32_0 : i32, i32
  }
  func.func @transform_12(%arg0: i32) -> (i32, i32) {
    %c0_i32 = arith.constant 0 : i32
    %c0_i32_0 = arith.constant 0 : i32
    %c0_i32_1 = arith.constant 0 : i32
    return %c0_i32, %c0_i32_0 : i32, i32
  }
  func.func @transform_13(%arg0: i32) -> (i32, i32, i32) {
    %c0_i32 = arith.constant 0 : i32
    %c0_i32_0 = arith.constant 0 : i32
    %c0_i32_1 = arith.constant 0 : i32
    return %arg0, %c0_i32, %c0_i32_0 : i32, i32, i32
  }
}

</mosaic_0001>

<bundles_post_ra>
// kernel: tpu_custom_call.1
= control target key start
LH: loop header
LB: loop body
LE: loop exit
PB: predicated region body
PF: predicated region fallthrough
CT: control target
= control target key end

     0   :  { %18 = vsyncpa [#allocation3], 0  ;;  %s3281_s0 = inlined_call_operand.hbm [shape: f32[2,8,128], index: 0, kind: input, shape index: {}]   ;;  %s3282_s1 = inlined_call_operand.hbm [shape: f32[1,128], index: 1, kind: input, shape index: {}]   ;;  %s3283_s2 = inlined_call_operand.hbm [shape: f32[1,128], index: 2, kind: input, shape index: {}]   ;;  %s3284_s3 = inlined_call_operand.hbm [shape: bf16[128,384], index: 3, kind: input, shape index: {}]   ;;  %s3285_s4 = inlined_call_operand.vmem [shape: f32[1,384], index: 4, kind: input, shape index: {}]   ;;  %s3286_s5 = inlined_call_operand.hbm [shape: bf16[128,128], index: 5, kind: input, shape index: {}]   ;;  %s3287_s6 = inlined_call_operand.hbm [shape: f32[1,128], index: 6, kind: input, shape index: {}]   ;;  %s3288_s7 = inlined_call_operand.hbm [shape: f32[1,128], index: 7, kind: input, shape index: {}]   ;;  %s3289_s8 = inlined_call_operand.hbm [shape: f32[1,128], index: 8, kind: input, shape index: {}]   ;;  %s3290_s9 = inlined_call_operand.hbm [shape: bf16[128,512], index: 9, kind: input, shape index: {}]   ;;  %s3291_s10 = inlined_call_operand.vmem [shape: f32[1,512], index: 10, kind: input, shape index: {}]   ;;  %s3292_s11 = inlined_call_operand.hbm [shape: bf16[512,128], index: 11, kind: input, shape index: {}]   ;;  %s3293_s12 = inlined_call_operand.vmem [shape: f32[1,128], index: 12, kind: input, shape index: {}]   ;;  %s3294_s13 = inlined_call_operand.hbm [shape: f32[2,8,128], index: 13, kind: output, shape index: {}]  }
   0x1   :  { %19 = vsyncpa [#allocation6], 0 }
   0x2   :  { %20 = vsyncpa [#allocation9], 0 }
   0x3   :  { %21 = vsyncpa [#allocation12], 0 }
   0x4   :  { %22 = vsyncpa [#allocation15], 0 }
   0x5   :  { %23 = vsyncpa [#allocation18], 0  ;;  %s43_s27 = sshll.u32 %s3282_s1, 4  ;;  %s44_s27 = int_to_ptr.hbm [resolvable:$true] %s43_s27 }
   0x6   :  { %24 = vsyncpa [#allocation4], 0  ;;  %s2799_s28 = smov [#allocation5]   ;;  %s64_s15 = sshll.u32 %s3284_s3, 4  ;;  %s65_s15 = int_to_ptr.hbm [resolvable:$true] %s64_s15 }
   0x7   :  { %s45_s29 = sshll.u32 %s2799_s28, 4  ;;  %s2800_s16 = smov [#allocation8]   ;;  %s46_s29 = int_to_ptr.vmem [resolvable:$true] %s45_s29 }
   0x8   :  { %48 = dma.hbm_to_vmem [thread:$0]  %s44_s27, 16, %s46_s29, [#allocation6]  }
   0x9   :  { %s66_s17 = sshll.u32 %s2800_s16, 4  ;;  %s2801_s18 = smov 192   ;;  %s67_s17 = int_to_ptr.vmem [resolvable:$true] %s66_s17 }
   0xa   :  { %s2802_s19 = smov 12   ;;  %s93_s1 = sshll.u32 %s3287_s6, 4  ;;  %s94_s1 = int_to_ptr.hbm [resolvable:$true] %s93_s1 }
   0xb   :  { %72 = dma.hbm_to_vmem [thread:$0]  %s65_s15, 3072, %s67_s17, [#allocation9], %s2801_s18, %s2801_s18, %s2802_s19  }
   0xc   :  { %s2803_s22 = smov [#allocation11]   ;;  %s115_s3 = sshll.u32 %s3289_s8, 4  ;;  %s116_s3 = int_to_ptr.hbm [resolvable:$true] %s115_s3 }
   0xd   :  { %s95_s23 = sshll.u32 %s2803_s22, 4  ;;  %s2804_s26 = smov [#allocation14]   ;;  %s96_s23 = int_to_ptr.vmem [resolvable:$true] %s95_s23 }
   0xe   :  { %98 = dma.hbm_to_vmem [thread:$0]  %s94_s1, 16, %s96_s23, [#allocation12]  }
   0xf   :  { %s117_s27 = sshll.u32 %s2804_s26, 4  ;;  %s29_s30 = sshll.u32 %s3281_s0, 4  ;;  %s118_s27 = int_to_ptr.vmem [resolvable:$true] %s117_s27  ;;  %s30_s30 = int_to_ptr.hbm [resolvable:$true] %s29_s30 }
  0x10   :  { %120 = dma.hbm_to_vmem [thread:$0]  %s116_s3, 16, %s118_s27, [#allocation15]  }
  0x11   :  { %s2805_s6 = smov [#allocation2]   ;;  %s54_s17 = sshll.u32 %s3283_s2, 4  ;;  %s55_s17 = int_to_ptr.hbm [resolvable:$true] %s54_s17 }
  0x12   :  { %s31_s14 = sshll.u32 %s2805_s6, 4  ;;  %s2806_s18 = smov 128   ;;  %s32_s14 = int_to_ptr.vmem [resolvable:$true] %s31_s14 }
  0x13   :  { %s2807_s8 = smov 8   ;;  %s2808_s19 = smov [#allocation7]  }
  0x14   :  { %37 = dma.hbm_to_vmem [thread:$0]  %s30_s30, 256, %s32_s14, [#allocation3], %s2806_s18, %s2806_s18, %s2807_s8  }
  0x15   :  { %s56_s20 = sshll.u32 %s2808_s19, 4  ;;  %s79_s1 = sshll.u32 %s3286_s5, 4  ;;  %s57_s20 = int_to_ptr.vmem [resolvable:$true] %s56_s20  ;;  %s80_s1 = int_to_ptr.hbm [resolvable:$true] %s79_s1 }
  0x16   :  { %59 = dma.hbm_to_vmem [thread:$0]  %s55_s17, 16, %s57_s20, [#allocation6]  }
  0x17   :  { %s2809_s22 = smov [#allocation10]   ;;  %s104_s25 = sshll.u32 %s3288_s7, 4  ;;  %s105_s25 = int_to_ptr.hbm [resolvable:$true] %s104_s25 }
  0x18   :  { %s81_s23 = sshll.u32 %s2809_s22, 4  ;;  %s2810_s3 = smov 64   ;;  %s82_s23 = int_to_ptr.vmem [resolvable:$true] %s81_s23 }
  0x19   :  { %s2811_s26 = smov 4   ;;  %s2812_s27 = smov [#allocation13]  }
  0x1a   :  { %87 = dma.hbm_to_vmem [thread:$0]  %s80_s1, 1024, %s82_s23, [#allocation9], %s2810_s3, %s2810_s3, %s2811_s26  }
  0x1b   :  { %s106_s28 = sshll.u32 %s2812_s27, 4  ;;  %s125_s30 = sshll.u32 %s3290_s9, 4  ;;  %s107_s28 = int_to_ptr.vmem [resolvable:$true] %s106_s28  ;;  %s126_s30 = int_to_ptr.hbm [resolvable:$true] %s125_s30 }
  0x1c   :  { %109 = dma.hbm_to_vmem [thread:$0]  %s105_s25, 16, %s107_s28, [#allocation12]  }
  0x1d   :  { %s2813_s6 = smov [#allocation16]   ;;  %s140_s16 = sshll.u32 %s3292_s11, 4  ;;  %s141_s16 = int_to_ptr.hbm [resolvable:$true] %s140_s16 }
  0x1e   :  { %s127_s14 = sshll.u32 %s2813_s6, 4  ;;  %s2814_s17 = smov 256   ;;  %s128_s14 = int_to_ptr.vmem [resolvable:$true] %s127_s14 }
  0x1f   :  { %s2815_s19 = smov 16   ;;  %s2816_s20 = smov [#allocation17]  }
  0x20   :  { %133 = dma.hbm_to_vmem [thread:$0]  %s126_s30, 4096, %s128_s14, [#allocation15], %s2814_s17, %s2814_s17, %s2815_s19  }
  0x21   :  { %s142_s0 = sshll.u32 %s2816_s20, 4  ;;  %s143_s0 = int_to_ptr.vmem [resolvable:$true] %s142_s0 }
  0x22   :  { %148 = dma.hbm_to_vmem [thread:$0]  %s141_s16, 4096, %s143_s0, [#allocation18], %s2810_s3, %s2810_s3, %s2811_s26  }
  0x23   :  { %2785 = dma.done.wait [#allocation3], 256  }
  0x24   :  { %2786 = vsyncadd [#allocation3], 4294967040 }
  0x25   :  { %2787 = dma.done.wait [#allocation6], 32  }
  0x26   :  { %2788 = vsyncadd [#allocation6], 4294967264 }
  0x27   :  { %2789 = dma.done.wait [#allocation9], 4096  }
  0x28   :  { %2790 = vsyncadd [#allocation9], 4294963200 }
  0x29   :  { %2791 = dma.done.wait [#allocation12], 32  }
  0x2a   :  { %2792 = vsyncadd [#allocation12], 4294967264 }
  0x2b   :  { %2793 = dma.done.wait [#allocation15], 4112  }
  0x2c   :  { %2794 = vsyncadd [#allocation15], 4294963184 }
  0x2d   :  { %2795 = dma.done.wait [#allocation18], 4096  }
  0x2e   :  { %2796 = vsyncadd [#allocation18], 4294963200  ;;  %v2929_v0 = vld [vmem:[#allocation2] sm:$0xff]  ;;  %v2932_v1 = vld [vmem:[#allocation2 + $0x8] sm:$0xff]  ;;  %v2817_v2 = vmov 128.0   ;;  %vm478_vm7 = vcmask 261120  }
  0x2f   :  { %196 = vadd.xlane.f32.xlu0 %v2929_v0  ;;  %2447 = vrcp.f32 %v2817_v2  ;;  %v1996_v17 = vld [vmem:[#allocation8 + $0xa8] sm:$0xf]  ;;  %v2344_v18 = vld [vmem:[#allocation8 + $0xb0] sm:$0xf0]  ;;  %v2343_v19 = vld [vmem:[#allocation8 + $0xac] sm:$0xf] }
  0x30   :  { %v1997_v20 = vor.u32 %v2344_v18, %v1996_v17  ;;  %v1998_v21 = vld [vmem:[#allocation8 + $0xb4] sm:$0xf0]  ;;  %v2004_v22 = vld [vmem:[#allocation8 + $0xb0] sm:$0xf]  ;;  %v2345_v23 = vld [vmem:[#allocation8 + $0xb8] sm:$0xf0] }
  0x31   :  { %v2001_v24 = vor.u32 %v2343_v19, %v1998_v21  ;;  %v2005_v25 = vor.u32 %v2345_v23, %v2004_v22  ;;  %v1984_v26 = vld [vmem:[#allocation8 + $0x90] sm:$0xf]  ;;  %v2341_v27 = vld [vmem:[#allocation8 + $0x98] sm:$0xf0]  ;;  %v2340_v28 = vld [vmem:[#allocation8 + $0x94] sm:$0xf] }
  0x32   :  { %422 = vmatpush.bf16.msra.mxu0 %v1997_v20  ;;  %v1985_v29 = vor.u32 %v2341_v27, %v1984_v26  ;;  %v1986_v30 = vld [vmem:[#allocation8 + $0x9c] sm:$0xf0]  ;;  %v1992_v31 = vld [vmem:[#allocation8 + $0x98] sm:$0xf]  ;;  %v2342_v32 = vld [vmem:[#allocation8 + $0xa0] sm:$0xf0] }
  0x33   :  { %436 = vmatpush.bf16.msra.mxu1 %v2001_v24  ;;  %450 = vmatpush.bf16.msra.mxu2 %v2005_v25  ;;  %v1989_v33 = vor.u32 %v2340_v28, %v1986_v30  ;;  %v1993_v34 = vor.u32 %v2342_v32, %v1992_v31  ;;  %v1972_v35 = vld [vmem:[#allocation8 + $0x78] sm:$0xf]  ;;  %v2338_v36 = vld [vmem:[#allocation8 + $0x80] sm:$0xf0]  ;;  %v2337_v37 = vld [vmem:[#allocation8 + $0x7c] sm:$0xf] }
  0x34   :  { %v1973_v38 = vor.u32 %v2338_v36, %v1972_v35  ;;  %v1974_v39 = vld [vmem:[#allocation8 + $0x84] sm:$0xf0]  ;;  %v1980_v40 = vld [vmem:[#allocation8 + $0x80] sm:$0xf]  ;;  %v2339_v41 = vld [vmem:[#allocation8 + $0x88] sm:$0xf0] }
  0x35   :  { %v2448_v3 = vpop.eup %2447  ;;  %v1977_v42 = vor.u32 %v2337_v37, %v1974_v39  ;;  %v1981_v43 = vor.u32 %v2339_v41, %v1980_v40  ;;  %v1960_v44 = vld [vmem:[#allocation8 + $0x60] sm:$0xf]  ;;  %v2335_v45 = vld [vmem:[#allocation8 + $0x68] sm:$0xf0]  ;;  %v2334_v46 = vld [vmem:[#allocation8 + $0x64] sm:$0xf] }
  0x36   :  { %v201_v4 = vmul.f32 128.0, %v2448_v3  ;;  %vm205_vm0 = vweird.f32 %v2448_v3  ;;  %423 = vmatpush.bf16.msra.mxu0 %v1985_v29  ;;  %v1961_v47 = vor.u32 %v2335_v45, %v1960_v44  ;;  %v1962_v48 = vld [vmem:[#allocation8 + $0x6c] sm:$0xf0]  ;;  %v1968_v49 = vld [vmem:[#allocation8 + $0x68] sm:$0xf]  ;;  %vm545_vm8 = vcmask 1043456  }
  0x37   :  { %198 = vadd.xlane.f32.xlu0 %v2932_v1  ;;  %437 = vmatpush.bf16.msra.mxu1 %v1989_v33  ;;  %v2336_v50 = vld [vmem:[#allocation8 + $0x70] sm:$0xf0]  ;;  %v1965_v51 = vor.u32 %v2334_v46, %v1962_v48  ;;  %v1948_v53 = vld [vmem:[#allocation8 + $0x48] sm:$0xf]  ;;  %v2331_v55 = vld [vmem:[#allocation8 + $0x4c] sm:$0xf] }
  0x38   :  { %v202_v5 = vsub.f32 1.0, %v201_v4  ;;  %451 = vmatpush.bf16.msra.mxu2 %v1993_v34  ;;  %v1969_v52 = vor.u32 %v2336_v50, %v1968_v49  ;;  %v2332_v54 = vld [vmem:[#allocation8 + $0x50] sm:$0xf0]  ;;  %v1950_v57 = vld [vmem:[#allocation8 + $0x54] sm:$0xf0]  ;;  %vm517_vm10 = vcmask 64512  }
  0x39   :  { %v1949_v56 = vor.u32 %v2332_v54, %v1948_v53  ;;  %v1956_v58 = vld [vmem:[#allocation8 + $0x50] sm:$0xf]  ;;  %v2333_v59 = vld [vmem:[#allocation8 + $0x58] sm:$0xf0]  ;;  %v1953_v60 = vor.u32 %v2331_v55, %v1950_v57  ;;  %v2328_v2 = vld [vmem:[#allocation8 + $0x34] sm:$0xf] }
  0x3a   :  { %v203_v6 = vmul.f32 %v2448_v3, %v202_v5  ;;  %424 = vmatpush.bf16.msra.mxu0 %v1973_v38  ;;  %v1957_v61 = vor.u32 %v2333_v59, %v1956_v58  ;;  %v1936_v62 = vld [vmem:[#allocation8 + $0x30] sm:$0xf]  ;;  %v2329_v63 = vld [vmem:[#allocation8 + $0x38] sm:$0xf0]  ;;  %v1938_v4 = vld [vmem:[#allocation8 + $0x3c] sm:$0xf0] }
  0x3b   :  { %438 = vmatpush.bf16.msra.mxu1 %v1977_v42  ;;  %v1944_v5 = vld [vmem:[#allocation8 + $0x38] sm:$0xf]  ;;  %v1932_v17 = vld [vmem:[#allocation8 + $0x20] sm:$0xf]  ;;  %v2327_v18 = vld [vmem:[#allocation8 + $0x28] sm:$0xf0] }
  0x3c   :  { %v204_v7 = vadd.f32 %v2448_v3, %v203_v6  ;;  %452 = vmatpush.bf16.msra.mxu2 %v1981_v43  ;;  %v2330_v6 = vld [vmem:[#allocation8 + $0x40] sm:$0xf0]  ;;  %v1933_v20 = vor.u32 %v2327_v18, %v1932_v17  ;;  %v1912_v21 = vld [vmem:[#allocation8] sm:$0xf]  ;;  %v2323_v22 = vld [vmem:[#allocation8 + $0x8] sm:$0xf0] }
  0x3d   :  { %v2322_v23 = vld [vmem:[#allocation8 + $0x4] sm:$0xf]  ;;  %v1913_v25 = vor.u32 %v2323_v22, %v1912_v21  ;;  %v1914_v26 = vld [vmem:[#allocation8 + $0xc] sm:$0xf0]  ;;  %v1920_v27 = vld [vmem:[#allocation8 + $0x8] sm:$0xf] }
  0x3e   :  { %v2935_v8 = vsel %vm205_vm0, %v2448_v3, %v204_v7  ;;  %425 = vmatpush.bf16.msra.mxu0 %v1961_v47  ;;  %v1937_v3 = vor.u32 %v2329_v63, %v1936_v62  ;;  %v1941_v7 = vor.u32 %v2328_v2, %v1938_v4  ;;  %v2324_v28 = vld [vmem:[#allocation8 + $0x10] sm:$0xf0]  ;;  %v1917_v30 = vor.u32 %v2322_v23, %v1914_v26  ;;  %v2441_v49 = vld [vmem:[#allocation5] ss:$0 sm:$0xff]  ;;  %v2442_v54 = vld [vmem:[#allocation7] ss:$0 sm:$0xff] }
  0x3f   :  { %439 = vmatpush.bf16.msra.mxu1 %v1965_v51  ;;  %v1921_v31 = vor.u32 %v2324_v28, %v1920_v27  ;;  %s2820_s21 = smov 32   ;;  %s2821_s2 = smov [#allocation19]  }
  0x40   :  { %453 = vmatpush.bf16.msra.mxu2 %v1969_v52  ;;  %s1890_s24 = sshll.u32 %s2821_s2, 4  ;;  %s1891_s24 = int_to_ptr.vmem [resolvable:$true] %s1890_s24 }
  0x42   :  { %426 = vmatpush.bf16.msra.mxu0 %v1949_v56 }
  0x43   :  { %440 = vmatpush.bf16.msra.mxu1 %v1953_v60 }
  0x44   :  { %454 = vmatpush.bf16.msra.mxu2 %v1957_v61 }
  0x46   :  { %427 = vmatpush.bf16.msra.mxu0 %v1937_v3 }
  0x47   :  { %441 = vmatpush.bf16.msra.mxu1 %v1941_v7 }
  0xa2   :  { %v197_v9 = vpop.xlane.xlu0 %196 }
  0xa3   :  { %v207_v10 = vmul.f32 %v2935_v8, %v197_v9  ;;  %v1945_v9 = vor.u32 %v2330_v6, %v1944_v5 }
  0xa5   :  { %v2939_v11 = vsub.f32 %v2929_v0, %v207_v10  ;;  %455 = vmatpush.bf16.msra.mxu2 %v1945_v9  ;;  %v1924_v10 = vld [vmem:[#allocation8 + $0x18] sm:$0xf] }
  0xa7   :  { %v211_v12 = vmul.f32 %v2939_v11, %v2939_v11 }
  0xa9   :  { %213 = vadd.xlane.f32.xlu1 %v211_v12  ;;  %v2326_v12 = vld [vmem:[#allocation8 + $0x20] sm:$0xf0]  ;;  %456 = vmatpush.bf16.msra.mxu2 %v1933_v20 }
  0xaa   :  { %v199_v13 = vpop.xlane.xlu0 %198 }
  0xab   :  { %v208_v14 = vmul.f32 %v2935_v8, %v199_v13  ;;  %v2325_v13 = vld [vmem:[#allocation8 + $0x1c] sm:$0xf] }
  0xad   :  { %v2945_v15 = vsub.f32 %v2932_v1, %v208_v14  ;;  %v1925_v14 = vor.u32 %v2326_v12, %v1924_v10  ;;  %457 = vmatpush.bf16.msra.mxu2 %v1921_v31 }
  0xaf   :  { %v212_v16 = vmul.f32 %v2945_v15, %v2945_v15  ;;  %428 = vmatpush.bf16.msra.mxu0 %v1925_v14 }
  0xb1   :  { %215 = vadd.xlane.f32.xlu1 %v212_v16  ;;  %v1926_v16 = vld [vmem:[#allocation8 + $0x24] sm:$0xf0] }
  0xb2   :  { %v1929_v19 = vor.u32 %v2325_v13, %v1926_v16 }
  0xb3   :  { %429 = vmatpush.bf16.msra.mxu0 %v1913_v25 }
  0xb4   :  { %442 = vmatpush.bf16.msra.mxu1 %v1929_v19 }
  0xb8   :  { %443 = vmatpush.bf16.msra.mxu1 %v1917_v30 }
 0x11c   :  { %v214_v24 = vpop.xlane.xlu1 %213 }
 0x11d   :  { %v217_v29 = vmul.f32 %v214_v24, %v2935_v8 }
 0x11f   :  { %v219_v32 = vadd.f32 1e-05, %v217_v29 }
 0x121   :  { %2449 = vrsqrt.f32 %v219_v32  ;;  %vm227_vm2 = vweird.f32 %v219_v32 }
 0x124   :  { %v216_v33 = vpop.xlane.xlu1 %215 }
 0x125   :  { %v218_v34 = vmul.f32 %v216_v33, %v2935_v8 }
 0x127   :  { %v2450_v35 = vpop.eup %2449  ;;  %v220_v36 = vadd.f32 1e-05, %v218_v34 }
 0x128   :  { %v222_v37 = vmul.f32 %v2450_v35, %v219_v32  ;;  %vm228_vm1 = vweird.f32 %v2450_v35 }
 0x129   :  { %2451 = vrsqrt.f32 %v220_v36  ;;  %vm229_vm3 = vmor %vm227_vm2, %vm228_vm1  ;;  %vm237_vm5 = vweird.f32 %v220_v36 }
 0x12a   :  { %v223_v38 = vmul.f32 %v2450_v35, %v222_v37 }
 0x12c   :  { %v224_v39 = vmul.f32 0.5, %v223_v38  ;;  %v466_v38 = vlaneseq }
 0x12e   :  { %v225_v40 = vsub.f32 1.5, %v224_v39 }
 0x12f   :  { %v2452_v41 = vpop.eup %2451 }
 0x130   :  { %v226_v42 = vmul.f32 %v2450_v35, %v225_v40  ;;  %v232_v43 = vmul.f32 %v2452_v41, %v220_v36  ;;  %vm238_vm4 = vweird.f32 %v2452_v41  ;;  %v467_v40 = vshrl.u32 %v466_v38, 7 }
 0x131   :  { %vm239_vm6 = vmor %vm237_vm5, %vm238_vm4 }
 0x132   :  { %v233_v44 = vmul.f32 %v2452_v41, %v232_v43  ;;  %v230_v45 = vsel %vm229_vm3, %v2450_v35, %v226_v42  ;;  %v2819_v43 = vmov 0.0  }
 0x133   :  { %v241_v48 = vmul.f32 %v230_v45, %v2939_v11  ;;  %v286_v11 = vld [vmem:[%s3285_s4] sm:$0x7]  ;;  %s2818_s4 = smov 96  }
 0x134   :  { %v234_v46 = vmul.f32 0.5, %v233_v44  ;;  %v288_v59 = vperm.slane %v286_v11, 0  ;;  %v289_v60 = vperm.slane %v286_v11, 1  ;;  %v290_v4 = vperm.slane %v286_v11, 2 }
 0x135   :  { %v246_v53 = vmul.f32 %v2441_v49, %v241_v48 }
 0x136   :  { %v235_v47 = vsub.f32 1.5, %v234_v46 }
 0x137   :  { %v251_v56 = vadd.f32 %v2442_v54, %v246_v53 }
 0x138   :  { %v236_v50 = vmul.f32 %v2452_v41, %v235_v47 }
 0x13a   :  { %v240_v51 = vsel %vm239_vm6, %v2452_v41, %v236_v50  ;;  %v469_v41 = vand.u32 127, %v466_v38 }
 0x13b   :  { %v242_v52 = vmul.f32 %v240_v51, %v2945_v15 }
 0x13c   :  { %vm470_vm9 = vcmp.gt.s32.totalorder %v469_v41, %v467_v40 }
 0x13d   :  { %v247_v55 = vmul.f32 %v2441_v49, %v242_v52  ;;  %v2988_v44 = vsel %vm470_vm9, -1e+09, %v2819_v43 }
 0x13f   :  { %v252_v57 = vadd.f32 %v2442_v54, %v247_v55 }
 0x141   :  { %v253_v58 = vpack.c.bf16 %v252_v57, %v251_v56 }
 0x143   :  { %430 = vmatmul.bf16.vlgmr.msra.gmra.mxu0 %v253_v58  ;;  %444 = vmatmul.bf16.vlgmr.msra.gmra.mxu1 %v253_v58 }
 0x144   :  { %458 = vmatmul.bf16.vlgmr.msra.gmra.mxu2 %v253_v58 }
 0x1c0   :  { %v431_v61 = vpop.f32.mrf.mxu0  ;;  %v445_v62 = vpop.f32.mrf.mxu1 }
 0x1c1   :  { %v432_v63 = vadd.f32 %v431_v61, %v288_v59  ;;  %v446_v2 = vadd.f32 %v445_v62, %v289_v60 }
 0x1c3   :  { %v464_v15 = vmul.f32 0.17677669, %v432_v63  ;;  %v474_v3 = vpack.c.bf16 %v446_v2, %v446_v2 }
 0x1c5   :  { %v592_v5 = vunpack.c.l.b16 %v474_v3  ;;  %v483_v6 = vsel %vm478_vm7, %v474_v3, 0  ;;  %v472_v7 = vpack.c.bf16 %v464_v15, %v464_v15 }
 0x1c6   :  { %492 = vmatpush.bf16.xpose.msra.mxu3 %v483_v6 }
 0x1c7   :  { %v2957_v9 = vpack.c.b16 %v592_v5, %v592_v5  ;;  %v459_v10 = vpop.f32.mrf.mxu2  ;;  %v587_v19 = vunpack.c.l.b16 %v472_v7 }
 0x1c8   :  { %v460_v12 = vadd.f32 %v459_v10, %v290_v4  ;;  %v433_v13 = vpop.f32.mrf.mxu0  ;;  %v447_v14 = vpop.f32.mrf.mxu1 }
 0x1c9   :  { %v434_v16 = vadd.f32 %v433_v13, %v288_v59  ;;  %v448_v17 = vadd.f32 %v447_v14, %v289_v60  ;;  %594 = vrot.lane.b32.xlu2 %v2957_v9, %s2818_s4  ;;  %v2969_v29 = vpack.c.b16 %v587_v19, %v587_v19 }
 0x1ca   :  { %v2961_v18 = vpack.c.bf16 %v460_v12, %v460_v12 }
 0x1cb   :  { %v465_v20 = vmul.f32 0.17677669, %v434_v16  ;;  %v475_v21 = vpack.c.bf16 %v448_v17, %v448_v17 }
 0x1cc   :  { %v547_v25 = vsel %vm545_vm8, %v2961_v18, 0  ;;  %v669_v5 = vunpack.c.l.b16 %v2961_v18 }
 0x1cd   :  { %v473_v22 = vpack.c.bf16 %v465_v20, %v465_v20  ;;  %v621_v23 = vunpack.c.l.b16 %v475_v21  ;;  %2006 = vmatmul.msk.bf16.vlgmr.msra.gmra.mxu3 %vm478_vm7, %v472_v7  ;;  %v502_v24 = vsel %vm478_vm7, %v475_v21, 0 }
 0x1ce   :  { %511 = vmatpush.bf16.xpose.msrb.mxu3 %v502_v24  ;;  %v3005_v6 = vpack.c.b16 %v669_v5, %v669_v5 }
 0x1cf   :  { %v616_v26 = vunpack.c.l.b16 %v473_v22  ;;  %v2967_v27 = vpack.c.b16 %v621_v23, %v621_v23  ;;  %v461_v28 = vpop.f32.mrf.mxu2 }
 0x1d0   :  { %v462_v30 = vadd.f32 %v461_v28, %v290_v4 }
 0x1d1   :  { %623 = vrot.lane.b32.xlu0 %v2967_v27, %s2818_s4  ;;  %589 = vrot.lane.b32.xlu2 %v2969_v29, %s2818_s4  ;;  %v2975_v31 = vpack.c.b16 %v616_v26, %v616_v26 }
 0x1d2   :  { %v2977_v32 = vpack.c.bf16 %v462_v30, %v462_v30 }
 0x1d3   :  { %618 = vrot.lane.b32.xlu1 %v2975_v31, %s2818_s4 }
 0x1d4   :  { %v566_v33 = vsel %vm545_vm8, %v2977_v32, 0  ;;  %v693_v23 = vunpack.c.l.b16 %v2977_v32 }
 0x1d5   :  { %575 = vmatpush.bf16.msrb.mxu0 %v566_v33 }
 0x1d6   :  { %556 = vmatpush.bf16.msra.mxu3 %v547_v25  ;;  %v3014_v24 = vpack.c.b16 %v693_v23, %v693_v23 }
 0x1dd   :  { %2007 = vmatmul.msk.bf16.vlgmr.msrb.gmra.mxu3 %vm478_vm7, %v473_v22 }
 0x223   :  { %v595_v34 = vpop.permute.xlu2 %594 }
 0x224   :  { %v600_v35 = vsel %vm478_vm7, %v595_v34, 0 }
 0x225   :  { %609 = vmatpush.bf16.xpose.msrb.mxu1 %v600_v35 }
 0x22b   :  { %v590_v36 = vpop.permute.xlu2 %589 }
 0x22c   :  { %2010 = vmatmul.msk.bf16.vlgmr.msrb.gmra.mxu1 %vm478_vm7, %v590_v36 }
 0x243   :  { %v624_v37 = vpop.permute.xlu0 %623 }
 0x244   :  { %v629_v39 = vsel %vm478_vm7, %v624_v37, 0 }
 0x245   :  { %638 = vmatpush.bf16.xpose.msrb.mxu2 %v629_v39  ;;  %v619_v42 = vpop.permute.xlu1 %618 }
 0x24c   :  { %2011 = vmatmul.msk.bf16.vlgmr.msrb.gmra.mxu2 %vm478_vm7, %v619_v42 }
 0x250   :  { %v494_v45 = vpop.f32.mrf.mxu3 }
 0x251   :  { %v495_v46 = vadd.f32 %v494_v45, %v2988_v44 }
 0x253   :  { %v518_v47 = vsel %vm517_vm10, %v495_v46, -inf }
 0x254   :  { %519 = vmax.xlane.f32.xlu2 %v518_v47 }
 0x258   :  { %v496_v48 = vpop.f32.mrf.mxu3 }
 0x260   :  { %v513_v49 = vpop.f32.mrf.mxu3 }
 0x261   :  { %v514_v20 = vadd.f32 %v513_v49, %v2988_v44 }
 0x263   :  { %v521_v18 = vsel %vm517_vm10, %v514_v20, -inf }
 0x268   :  { %v515_v50 = vpop.f32.mrf.mxu3 }
 0x2a9   :  { %v611_v51 = vpop.f32.mrf.mxu1 }
 0x2aa   :  { %v612_v52 = vadd.f32 %v611_v51, %v2988_v44 }
 0x2ac   :  { %v644_v53 = vsel %vm517_vm10, %v612_v52, -inf }
 0x2ad   :  { %645 = vmax.xlane.f32.xlu0 %v644_v53  ;;  %v2349_v53 = vld [vmem:[#allocation10 + $0x18] sm:$0xff] }
 0x2ae   :  { %742 = vmatpush.bf16.msra.mxu1 %v2349_v53 }
 0x2b1   :  { %v613_v54 = vpop.f32.mrf.mxu1 }
 0x2b2   :  { %v2348_v54 = vld [vmem:[#allocation10 + $0x10] sm:$0xff] }
 0x2b3   :  { %743 = vmatpush.bf16.msra.mxu1 %v2348_v54 }
 0x2c1   :  { %781 = vrot.lane.b32.xlu0 %v2957_v9, %s2810_s3 }
 0x2c7   :  { %v520_v55 = vpop.xlane.xlu2 %519 }
 0x2c8   :  { %v524_v56 = vsub.f32 %v495_v46, %v520_v55 }
 0x2ca   :  { %v526_v57 = vmul.f32 1.442695, %v524_v56 }
 0x2cc   :  { %2453 = vpow2.f32 %v526_v57 }
 0x2cf   :  { %v640_v58 = vpop.f32.mrf.mxu2 }
 0x2d0   :  { %v641_v61 = vadd.f32 %v640_v58, %v2988_v44 }
 0x2d2   :  { %v2454_v11 = vpop.eup %2453  ;;  %v647_v62 = vsel %vm517_vm10, %v641_v61, -inf }
 0x2d3   :  { %v530_v59 = vsel %vm517_vm10, %v2454_v11, 0.0 }
 0x2d4   :  { %531 = vadd.xlane.f32.xlu1 %v530_v59 }
 0x2d7   :  { %v642_v60 = vpop.f32.mrf.mxu2 }
 0x2eb   :  { %648 = vmax.xlane.f32.xlu0 %v647_v62 }
 0x2ed   :  { %779 = vrot.lane.b32.xlu1 %v2969_v29, %s2810_s3 }
 0x2ff   :  { %804 = vrot.lane.b32.xlu0 %v2967_v27, %s2810_s3 }
 0x320   :  { %v646_v63 = vpop.xlane.xlu0 %645 }
 0x321   :  { %v650_v2 = vsub.f32 %v612_v52, %v646_v63 }
 0x323   :  { %v652_v15 = vmul.f32 1.442695, %v650_v2 }
 0x325   :  { %2455 = vpow2.f32 %v652_v15 }
 0x32b   :  { %v2456_v3 = vpop.eup %2455 }
 0x32c   :  { %v656_v4 = vsel %vm517_vm10, %v2456_v3, 0.0 }
 0x32d   :  { %657 = vadd.xlane.f32.xlu2 %v656_v4 }
 0x333   :  { %v782_v14 = vpop.permute.xlu0 %781 }
 0x334   :  { %v787_v34 = vsel %vm478_vm7, %v782_v14, 0 }
 0x345   :  { %671 = vrot.lane.b32.xlu2 %v3005_v6, %s2818_s4 }
 0x347   :  { %v532_v7 = vpop.xlane.xlu1 %531 }
 0x348   :  { %2457 = vrcp.f32 %v532_v7 }
 0x34e   :  { %v2458_v10 = vpop.eup %2457 }
 0x34f   :  { %v538_v12 = vmul.f32 %v2458_v10, %v2454_v11 }
 0x351   :  { %v540_v13 = vpack.c.bf16 %v538_v12, %v538_v12 }
 0x353   :  { %2008 = vmatmul.msk.bf16.vlgmr.msra.gmra.mxu3 %vm517_vm10, %v540_v13  ;;  %v2346_v13 = vld [vmem:[#allocation10] sm:$0xff] }
 0x35e   :  { %v649_v16 = vpop.xlane.xlu0 %648 }
 0x35f   :  { %v651_v17 = vsub.f32 %v641_v61, %v649_v16  ;;  %v780_v32 = vpop.permute.xlu1 %779 }
 0x361   :  { %v654_v19 = vmul.f32 1.442695, %v651_v17 }
 0x363   :  { %2459 = vpow2.f32 %v654_v19 }
 0x369   :  { %v2460_v21 = vpop.eup %2459 }
 0x36a   :  { %v659_v22 = vsel %vm517_vm10, %v2460_v21, 0.0 }
 0x36e   :  { %522 = vmax.xlane.f32.xlu2 %v521_v18 }
 0x371   :  { %v805_v55 = vpop.permute.xlu0 %804 }
 0x372   :  { %v810_v57 = vsel %vm478_vm7, %v805_v55, 0 }
 0x376   :  { %660 = vadd.xlane.f32.xlu2 %v659_v22 }
 0x38e   :  { %695 = vrot.lane.b32.xlu2 %v3014_v24, %s2818_s4 }
 0x3a0   :  { %v658_v25 = vpop.xlane.xlu2 %657 }
 0x3a1   :  { %2461 = vrcp.f32 %v658_v25 }
 0x3a7   :  { %v2462_v26 = vpop.eup %2461 }
 0x3a8   :  { %v664_v28 = vmul.f32 %v2462_v26, %v2456_v3  ;;  %v672_v30 = vpop.permute.xlu2 %671  ;;  %v2347_v3 = vld [vmem:[#allocation10 + $0x8] sm:$0xff] }
 0x3a9   :  { %v677_v33 = vsel %vm545_vm8, %v672_v30, 0  ;;  %771 = vmatpush.bf16.msra.mxu2 %v2347_v3 }
 0x3aa   :  { %v666_v35 = vpack.c.bf16 %v664_v28, %v664_v28  ;;  %686 = vmatpush.bf16.msrb.mxu3 %v677_v33 }
 0x3ad   :  { %2012 = vmatmul.msk.bf16.vlgmr.msrb.gmra.mxu3 %vm517_vm10, %v666_v35  ;;  %772 = vmatpush.bf16.msra.mxu2 %v2346_v13 }
 0x3ae   :  { %796 = vmatpush.bf16.xpose.msra.mxu3 %v787_v34 }
 0x3bd   :  { %2032 = vmatmul.msk.bf16.vlgmr.msra.gmra.mxu3 %vm478_vm7, %v780_v32 }
 0x3d6   :  { %v3022_v36 = vpop.f32.mrf.mxu3 }
 0x3de   :  { %v560_v37 = vpop.f32.mrf.mxu3 }
 0x3e1   :  { %v523_v38 = vpop.xlane.xlu2 %522 }
 0x3e2   :  { %v525_v39 = vsub.f32 %v514_v20, %v523_v38 }
 0x3e4   :  { %v528_v40 = vmul.f32 1.442695, %v525_v39 }
 0x3e6   :  { %2463 = vpow2.f32 %v528_v40 }
 0x3e9   :  { %v661_v41 = vpop.xlane.xlu2 %660 }
 0x3ec   :  { %v2464_v42 = vpop.eup %2463 }
 0x3ed   :  { %v533_v43 = vsel %vm517_vm10, %v2464_v42, 0.0 }
 0x3ee   :  { %534 = vadd.xlane.f32.xlu1 %v533_v43 }
 0x3f1   :  { %v696_v45 = vpop.permute.xlu2 %695 }
 0x3f2   :  { %v701_v46 = vsel %vm545_vm8, %v696_v45, 0 }
 0x3f3   :  { %710 = vmatpush.bf16.msra.mxu0 %v701_v46 }
 0x407   :  { %802 = vrot.lane.b32.xlu1 %v2975_v31, %s2810_s3 }
 0x40f   :  { %849 = vrot.lane.b32.xlu1 %v3005_v6, %s2810_s3 }
 0x417   :  { %929 = vrot.lane.b32.xlu1 %v2957_v9, %s2820_s21 }
 0x41f   :  { %952 = vrot.lane.b32.xlu1 %v2967_v27, %s2820_s21 }
 0x427   :  { %927 = vrot.lane.b32.xlu1 %v2969_v29, %s2820_s21 }
 0x430   :  { %v688_v47 = vpop.f32.mrf.mxu3 }
 0x438   :  { %v690_v48 = vpop.f32.mrf.mxu3 }
 0x440   :  { %v798_v49 = vpop.f32.mrf.mxu3 }
 0x441   :  { %v799_v50 = vadd.f32 %v798_v49, %v2988_v44 }
 0x443   :  { %v825_v51 = vsel %vm517_vm10, %v799_v50, -inf }
 0x444   :  { %826 = vmax.xlane.f32.xlu0 %v825_v51 }
 0x448   :  { %v800_v52 = vpop.f32.mrf.mxu3 }
 0x458   :  { %950 = vrot.lane.b32.xlu0 %v2975_v31, %s2820_s21 }
 0x461   :  { %v535_v9 = vpop.xlane.xlu1 %534 }
 0x462   :  { %2465 = vrcp.f32 %v535_v9 }
 0x463   :  { %2467 = vrcp.f32 %v661_v41 }
 0x468   :  { %v2466_v27 = vpop.eup %2465 }
 0x469   :  { %v539_v29 = vmul.f32 %v2466_v27, %v2464_v42  ;;  %v2468_v58 = vpop.eup %2467 }
 0x46a   :  { %v665_v11 = vmul.f32 %v2468_v58, %v2460_v21 }
 0x46b   :  { %v541_v56 = vpack.c.bf16 %v539_v29, %v539_v29 }
 0x46c   :  { %v667_v31 = vpack.c.bf16 %v665_v11, %v665_v11 }
 0x46d   :  { %2009 = vmatmul.msk.bf16.vlgmr.msrb.gmra.mxu0 %vm517_vm10, %v541_v56 }
 0x46e   :  { %819 = vmatpush.bf16.xpose.msrb.mxu0 %v810_v57 }
 0x479   :  { %v803_v59 = vpop.permute.xlu1 %802 }
 0x47d   :  { %2013 = vmatmul.msk.bf16.vlgmr.msra.gmra.mxu0 %vm517_vm10, %v667_v31 }
 0x481   :  { %v850_v60 = vpop.permute.xlu1 %849 }
 0x482   :  { %v855_v61 = vsel %vm545_vm8, %v850_v60, 0 }
 0x483   :  { %864 = vmatpush.bf16.msrb.mxu1 %v855_v61 }
 0x489   :  { %v930_v62 = vpop.permute.xlu1 %929 }
 0x48a   :  { %v935_v63 = vsel %vm478_vm7, %v930_v62, 0 }
 0x48b   :  { %944 = vmatpush.bf16.xpose.msra.mxu0 %v935_v63 }
 0x48d   :  { %2033 = vmatmul.msk.bf16.vlgmr.msrb.gmra.mxu0 %vm478_vm7, %v803_v59 }
 0x491   :  { %v953_v2 = vpop.permute.xlu1 %952 }
 0x492   :  { %v958_v18 = vsel %vm478_vm7, %v953_v2, 0 }
 0x499   :  { %v928_v15 = vpop.permute.xlu1 %927 }
 0x49d   :  { %2045 = vmatmul.msk.bf16.vlgmr.msra.gmra.mxu0 %vm478_vm7, %v928_v15 }
 0x4b7   :  { %v827_v4 = vpop.xlane.xlu0 %826 }
 0x4b8   :  { %v831_v5 = vsub.f32 %v799_v50, %v827_v4 }
 0x4ba   :  { %v833_v7 = vmul.f32 1.442695, %v831_v5  ;;  %v2351_v5 = vld [vmem:[#allocation10 + $0x28] sm:$0xff] }
 0x4bb   :  { %917 = vmatpush.bf16.msrb.mxu3 %v2351_v5 }
 0x4bc   :  { %2469 = vpow2.f32 %v833_v7 }
 0x4c2   :  { %v2470_v10 = vpop.eup %2469 }
 0x4c3   :  { %v837_v12 = vsel %vm517_vm10, %v2470_v10, 0.0 }
 0x4c4   :  { %838 = vadd.xlane.f32.xlu2 %v837_v12  ;;  %v2350_v12 = vld [vmem:[#allocation10 + $0x20] sm:$0xff] }
 0x4c5   :  { %918 = vmatpush.bf16.msrb.mxu3 %v2350_v12 }
 0x4ca   :  { %v951_v38 = vpop.permute.xlu0 %950 }
 0x4ea   :  { %v577_v14 = vpop.f32.mrf.mxu0 }
 0x4eb   :  { %v581_v16 = vpack.c.bf16 %v577_v14, %v3022_v36 }
 0x4ed   :  { %2031 = vmatmul.msk.bf16.vlgmr.msra.gmra.mxu2 %vm478_vm7, %v581_v16 }
 0x4f2   :  { %v579_v17 = vpop.f32.mrf.mxu0 }
 0x4fa   :  { %v712_v19 = vpop.f32.mrf.mxu0 }
 0x4fb   :  { %v716_v20 = vpack.c.bf16 %v712_v19, %v688_v47 }
 0x4fd   :  { %2022 = vmatmul.msk.bf16.vlgmr.msra.gmra.mxu1 %vm478_vm7, %v716_v20 }
 0x4fe   :  { %967 = vmatpush.bf16.xpose.msra.mxu1 %v958_v18 }
 0x502   :  { %v714_v21 = vpop.f32.mrf.mxu0 }
 0x50a   :  { %v821_v22 = vpop.f32.mrf.mxu0 }
 0x50b   :  { %v822_v23 = vadd.f32 %v821_v22, %v2988_v44 }
 0x50d   :  { %v828_v25 = vsel %vm517_vm10, %v822_v23, -inf }
 0x50e   :  { %829 = vmax.xlane.f32.xlu2 %v828_v25 }
 0x512   :  { %v823_v26 = vpop.f32.mrf.mxu0 }
 0x51a   :  { %v946_v28 = vpop.f32.mrf.mxu0 }
 0x51b   :  { %v947_v30 = vadd.f32 %v946_v28, %v2988_v44 }
 0x51d   :  { %v973_v33 = vsel %vm517_vm10, %v947_v30, -inf }
 0x51e   :  { %974 = vmax.xlane.f32.xlu0 %v973_v33  ;;  %v2352_v33 = vld [vmem:[#allocation10 + $0x30] sm:$0xff] }
 0x522   :  { %v948_v34 = vpop.f32.mrf.mxu0 }
 0x526   :  { %870 = vrot.lane.b32.xlu2 %v3014_v24, %s2810_s3  ;;  %s1892_s3 = sshll.u32 %s3294_s13, 4  ;;  %s1893_s3 = int_to_ptr.hbm [resolvable:$true] %s1892_s3 }
 0x532   :  { %997 = vrot.lane.b32.xlu0 %v3005_v6, %s2820_s21 }
 0x537   :  { %v839_v35 = vpop.xlane.xlu2 %838 }
 0x538   :  { %2471 = vrcp.f32 %v839_v35 }
 0x53e   :  { %v2472_v32 = vpop.eup %2471 }
 0x53f   :  { %v845_v36 = vmul.f32 %v2472_v32, %v2470_v10 }
 0x541   :  { %v847_v37 = vpack.c.bf16 %v845_v36, %v845_v36 }
 0x543   :  { %2034 = vmatmul.msk.bf16.vlgmr.msrb.gmra.mxu1 %vm517_vm10, %v847_v37  ;;  %v2443_v37 = vld [vmem:[#allocation11] ss:$0 sm:$0xff] }
 0x553   :  { %2046 = vmatmul.msk.bf16.vlgmr.msra.gmra.mxu1 %vm478_vm7, %v951_v38 }
 0x570   :  { %v774_v39 = vpop.f32.mrf.mxu2 }
 0x578   :  { %v776_v13 = vpop.f32.mrf.mxu2 }
 0x57a   :  { %v745_v40 = vpop.f32.mrf.mxu1 }
 0x57b   :  { %v3062_v41 = vadd.f32 %v774_v39, %v745_v40 }
 0x581   :  { %v830_v42 = vpop.xlane.xlu2 %829 }
 0x582   :  { %v832_v43 = vsub.f32 %v822_v23, %v830_v42  ;;  %v3068_v27 = vpop.f32.mrf.mxu1 }
 0x583   :  { %v777_v42 = vadd.f32 %v776_v13, %v3068_v27  ;;  %v2382_v27 = vld [vmem:[#allocation16 + $0xe4] sm:$0xf]  ;;  %v2140_v13 = vld [vmem:[#allocation16 + $0xa0] sm:$0xf] }
 0x584   :  { %v835_v45 = vmul.f32 1.442695, %v832_v43 }
 0x586   :  { %2473 = vpow2.f32 %v835_v45 }
 0x589   :  { %v871_v46 = vpop.permute.xlu2 %870 }
 0x58a   :  { %v876_v6 = vsel %vm545_vm8, %v871_v46, 0 }
 0x58b   :  { %885 = vmatpush.bf16.msrb.mxu2 %v876_v6 }
 0x58c   :  { %v2474_v47 = vpop.eup %2473 }
 0x58d   :  { %v840_v48 = vsel %vm517_vm10, %v2474_v47, 0.0 }
 0x58e   :  { %841 = vadd.xlane.f32.xlu1 %v840_v48 }
 0x591   :  { %v975_v49 = vpop.xlane.xlu0 %974 }
 0x592   :  { %v979_v50 = vsub.f32 %v947_v30, %v975_v49 }
 0x594   :  { %v981_v51 = vmul.f32 1.442695, %v979_v50 }
 0x596   :  { %2475 = vpow2.f32 %v981_v51 }
 0x59c   :  { %v2476_v52 = vpop.eup %2475 }
 0x59d   :  { %v985_v53 = vsel %vm517_vm10, %v2476_v52, 0.0 }
 0x59e   :  { %986 = vadd.xlane.f32.xlu1 %v985_v53 }
 0x5a4   :  { %v998_v9 = vpop.permute.xlu0 %997 }
 0x5a5   :  { %v1003_v54 = vsel %vm545_vm8, %v998_v9, 0  ;;  %v2172_v9 = vld [vmem:[#allocation16 + $0xe0] sm:$0xf] }
 0x5a6   :  { %1012 = vmatpush.bf16.msra.mxu2 %v1003_v54  ;;  %v2384_v54 = vld [vmem:[#allocation16 + $0xec] sm:$0xf0] }
 0x5c0   :  { %v866_v29 = vpop.f32.mrf.mxu1 }
 0x5c8   :  { %v868_v55 = vpop.f32.mrf.mxu1 }
 0x5c9   :  { %v2174_v55 = vld [vmem:[#allocation16 + $0xf0] sm:$0xf0] }
 0x5d0   :  { %v969_v56 = vpop.f32.mrf.mxu1 }
 0x5d1   :  { %v970_v57 = vadd.f32 %v969_v56, %v2988_v44  ;;  %v2180_v56 = vld [vmem:[#allocation16 + $0xe8] sm:$0xf] }
 0x5d3   :  { %v976_v58 = vsel %vm517_vm10, %v970_v57, -inf }
 0x5d4   :  { %977 = vmax.xlane.f32.xlu2 %v976_v58  ;;  %v2177_v58 = vor.u32 %v2382_v27, %v2174_v55  ;;  %v2364_v27 = vld [vmem:[#allocation16 + $0x4c] sm:$0xf0] }
 0x5d8   :  { %v971_v11 = vpop.f32.mrf.mxu1 }
 0x601   :  { %v842_v59 = vpop.xlane.xlu1 %841 }
 0x602   :  { %2477 = vrcp.f32 %v842_v59  ;;  %v2383_v59 = vld [vmem:[#allocation16 + $0xec] sm:$0xf] }
 0x608   :  { %v2478_v31 = vpop.eup %2477 }
 0x609   :  { %v846_v60 = vmul.f32 %v2478_v31, %v2474_v47  ;;  %v2182_v31 = vld [vmem:[#allocation16 + $0xf8] sm:$0xf0] }
 0x60b   :  { %v848_v61 = vpack.c.bf16 %v846_v60, %v846_v60  ;;  %v2185_v60 = vor.u32 %v2383_v59, %v2182_v31  ;;  %v2363_v31 = vld [vmem:[#allocation16 + $0x4c] sm:$0xf] }
 0x60d   :  { %2035 = vmatmul.msk.bf16.vlgmr.msrb.gmra.mxu2 %vm517_vm10, %v848_v61  ;;  %v2156_v61 = vld [vmem:[#allocation16 + $0xc0] sm:$0xf] }
 0x60e   :  { %1352 = vmatpush.bf16.msrb.mxu2 %v2177_v58  ;;  %v2365_v58 = vld [vmem:[#allocation16 + $0x54] sm:$0xf0] }
 0x611   :  { %v987_v62 = vpop.xlane.xlu1 %986 }
 0x612   :  { %2479 = vrcp.f32 %v987_v62  ;;  %v2380_v62 = vld [vmem:[#allocation16 + $0xcc] sm:$0xf0] }
 0x618   :  { %v2480_v63 = vpop.eup %2479 }
 0x619   :  { %v993_v2 = vmul.f32 %v2480_v63, %v2476_v52  ;;  %v2378_v63 = vld [vmem:[#allocation16 + $0xc4] sm:$0xf] }
 0x61b   :  { %v995_v15 = vpack.c.bf16 %v993_v2, %v993_v2  ;;  %v2157_v2 = vor.u32 %v2380_v62, %v2156_v61  ;;  %v2076_v62 = vld [vmem:[#allocation16 + $0x20] sm:$0xf] }
 0x61d   :  { %2047 = vmatmul.msk.bf16.vlgmr.msra.gmra.mxu2 %vm517_vm10, %v995_v15  ;;  %v2158_v15 = vld [vmem:[#allocation16 + $0xd0] sm:$0xf0] }
 0x647   :  { %v978_v3 = vpop.xlane.xlu2 %977 }
 0x648   :  { %v980_v44 = vsub.f32 %v970_v57, %v978_v3  ;;  %v2385_v57 = vld [vmem:[#allocation16 + $0xf4] sm:$0xf0]  ;;  %v2164_v3 = vld [vmem:[#allocation16 + $0xc8] sm:$0xf] }
 0x649   :  { %v2181_v11 = vor.u32 %v2385_v57, %v2180_v56  ;;  %v2094_v56 = vld [vmem:[#allocation16 + $0x50] sm:$0xf0]  ;;  %v2100_v57 = vld [vmem:[#allocation16 + $0x48] sm:$0xf] }
 0x64a   :  { %v983_v4 = vmul.f32 1.442695, %v980_v44  ;;  %v2381_v44 = vld [vmem:[#allocation16 + $0xd4] sm:$0xf0]  ;;  %v2101_v59 = vor.u32 %v2365_v58, %v2100_v57 }
 0x64b   :  { %v2165_v5 = vor.u32 %v2381_v44, %v2164_v3  ;;  %v2078_v3 = vld [vmem:[#allocation16 + $0x30] sm:$0xf0]  ;;  %v2084_v44 = vld [vmem:[#allocation16 + $0x28] sm:$0xf] }
 0x64c   :  { %2481 = vpow2.f32 %v983_v4  ;;  %v2161_v4 = vor.u32 %v2378_v63, %v2158_v15  ;;  %v2360_v63 = vld [vmem:[#allocation16 + $0x2c] sm:$0xf0] }
 0x64d   :  { %v2077_v15 = vor.u32 %v2360_v63, %v2076_v62 }
 0x64e   :  { %1353 = vmatpush.bf16.msrb.mxu2 %v2161_v4  ;;  %v2361_v4 = vld [vmem:[#allocation16 + $0x34] sm:$0xf0] }
 0x652   :  { %v2482_v7 = vpop.eup %2481 }
 0x653   :  { %v988_v10 = vsel %vm517_vm10, %v2482_v7, 0.0 }
 0x654   :  { %989 = vadd.xlane.f32.xlu1 %v988_v10  ;;  %v2166_v10 = vld [vmem:[#allocation16 + $0xd8] sm:$0xf0] }
 0x66d   :  { %1018 = vrot.lane.b32.xlu1 %v3014_v24, %s2820_s21  ;;  %v2353_v24 = vld [vmem:[#allocation10 + $0x38] sm:$0xff] }
 0x66e   :  { %1065 = vmatpush.bf16.msrb.mxu0 %v2353_v24  ;;  %v2124_v24 = vld [vmem:[#allocation16 + $0x80] sm:$0xf] }
 0x672   :  { %1066 = vmatpush.bf16.msrb.mxu0 %v2352_v33 }
 0x676   :  { %1380 = vmatpush.bf16.msra.mxu0 %v2185_v60  ;;  %v2102_v60 = vld [vmem:[#allocation16 + $0x58] sm:$0xf0] }
 0x677   :  { %v2105_v61 = vor.u32 %v2363_v31, %v2102_v60 }
 0x690   :  { %v887_v14 = vpop.f32.mrf.mxu2 }
 0x691   :  { %v891_v16 = vpack.c.bf16 %v887_v14, %v866_v29  ;;  %v2173_v29 = vor.u32 %v2384_v54, %v2172_v9  ;;  %v2376_v14 = vld [vmem:[#allocation16 + $0xac] sm:$0xf0]  ;;  %v2092_v54 = vld [vmem:[#allocation16 + $0x40] sm:$0xf] }
 0x692   :  { %v2093_v55 = vor.u32 %v2364_v27, %v2092_v54  ;;  %v2445_v54 = vld [vmem:[#allocation14] ss:$0 sm:$0xff] }
 0x693   :  { %2044 = vmatmul.msk.bf16.vlgmr.msrb.gmra.mxu3 %vm478_vm7, %v891_v16  ;;  %1338 = vmatpush.bf16.msrb.mxu1 %v2173_v29  ;;  %v2374_v16 = vld [vmem:[#allocation16 + $0xa4] sm:$0xf] }
 0x694   :  { %v2362_v29 = vld [vmem:[#allocation16 + $0x44] sm:$0xf] }
 0x697   :  { %1339 = vmatpush.bf16.msrb.mxu1 %v2157_v2  ;;  %v2358_v2 = vld [vmem:[#allocation16 + $0x24] sm:$0xf] }
 0x698   :  { %v889_v17 = vpop.f32.mrf.mxu2 }
 0x699   :  { %v2141_v17 = vor.u32 %v2376_v14, %v2140_v13  ;;  %v2086_v13 = vld [vmem:[#allocation16 + $0x38] sm:$0xf0]  ;;  %v2060_v14 = vld [vmem:[#allocation16] sm:$0xf] }
 0x69b   :  { %1340 = vmatpush.bf16.msrb.mxu1 %v2141_v17 }
 0x6a0   :  { %v1014_v19 = vpop.f32.mrf.mxu2 }
 0x6a8   :  { %v1016_v20 = vpop.f32.mrf.mxu2 }
 0x6a9   :  { %v2148_v20 = vld [vmem:[#allocation16 + $0xa8] sm:$0xf] }
 0x6c7   :  { %v990_v18 = vpop.xlane.xlu1 %989 }
 0x6c8   :  { %2483 = vrcp.f32 %v990_v18  ;;  %v2377_v18 = vld [vmem:[#allocation16 + $0xb4] sm:$0xf0] }
 0x6ce   :  { %v2484_v21 = vpop.eup %2483 }
 0x6cf   :  { %v994_v22 = vmul.f32 %v2484_v21, %v2482_v7  ;;  %v2379_v7 = vld [vmem:[#allocation16 + $0xcc] sm:$0xf] }
 0x6d0   :  { %v2169_v12 = vor.u32 %v2379_v7, %v2166_v10  ;;  %v2081_v7 = vor.u32 %v2358_v2, %v2078_v3  ;;  %v2085_v10 = vor.u32 %v2361_v4, %v2084_v44  ;;  %v2392_v2 = vld [vmem:[#allocation17 + $0x30] sm:$0xff] }
 0x6d1   :  { %v996_v26 = vpack.c.bf16 %v994_v22, %v994_v22  ;;  %v2149_v22 = vor.u32 %v2377_v18, %v2148_v20  ;;  %v2354_v20 = vld [vmem:[#allocation16 + $0x4] sm:$0xf]  ;;  %v2062_v18 = vld [vmem:[#allocation16 + $0x10] sm:$0xf0] }
 0x6d2   :  { %1381 = vmatpush.bf16.msra.mxu0 %v2169_v12  ;;  %v2359_v12 = vld [vmem:[#allocation16 + $0x2c] sm:$0xf] }
 0x6d3   :  { %v2089_v17 = vor.u32 %v2359_v12, %v2086_v13 }
 0x6df   :  { %v1019_v23 = vpop.permute.xlu1 %1018 }
 0x6e0   :  { %v1024_v25 = vsel %vm545_vm8, %v1019_v23, 0  ;;  %v2375_v23 = vld [vmem:[#allocation16 + $0xac] sm:$0xf] }
 0x6e1   :  { %1033 = vmatpush.bf16.msra.mxu3 %v1024_v25  ;;  %v2150_v25 = vld [vmem:[#allocation16 + $0xb8] sm:$0xf0] }
 0x6e4   :  { %2048 = vmatmul.msk.bf16.vlgmr.msra.gmra.mxu3 %vm517_vm10, %v996_v26  ;;  %v2153_v26 = vor.u32 %v2375_v23, %v2150_v25  ;;  %v2068_v23 = vld [vmem:[#allocation16 + $0x8] sm:$0xf]  ;;  %v2357_v25 = vld [vmem:[#allocation16 + $0x14] sm:$0xf0] }
 0x6e5   :  { %1366 = vmatpush.bf16.msrb.mxu3 %v2181_v11  ;;  %v2097_v11 = vor.u32 %v2362_v29, %v2094_v56 }
 0x6e6   :  { %1382 = vmatpush.bf16.msra.mxu0 %v2153_v26  ;;  %v2355_v26 = vld [vmem:[#allocation16 + $0xc] sm:$0xf] }
 0x6e9   :  { %1367 = vmatpush.bf16.msrb.mxu3 %v2165_v5 }
 0x6ed   :  { %1368 = vmatpush.bf16.msrb.mxu3 %v2149_v22  ;;  %v2065_v22 = vor.u32 %v2354_v20, %v2062_v18 }
 0x716   :  { %v920_v28 = vpop.f32.mrf.mxu3 }
 0x717   :  { %v925_v30 = vadd.f32 %v920_v28, %v3062_v41  ;;  %v2372_v28 = vld [vmem:[#allocation16 + $0x8c] sm:$0xf0] }
 0x718   :  { %v2125_v33 = vor.u32 %v2372_v28, %v2124_v24  ;;  %v2069_v28 = vor.u32 %v2357_v25, %v2068_v23  ;;  %v2400_v23 = vld [vmem:[#allocation17 + $0x70] sm:$0xff] }
 0x719   :  { %v2408_v25 = vld [vmem:[#allocation17 + $0xb0] sm:$0xff] }
 0x71a   :  { %1341 = vmatpush.bf16.msrb.mxu1 %v2125_v33 }
 0x71e   :  { %v922_v34 = vpop.f32.mrf.mxu3 }
 0x71f   :  { %v926_v45 = vadd.f32 %v922_v34, %v777_v42  ;;  %v2126_v34 = vld [vmem:[#allocation16 + $0x90] sm:$0xf0]  ;;  %v2108_v42 = vld [vmem:[#allocation16 + $0x60] sm:$0xf] }
 0x767   :  { %v1035_v35 = vpop.f32.mrf.mxu3 }
 0x768   :  { %v1039_v32 = vpack.c.bf16 %v1035_v35, %v1014_v19  ;;  %v2142_v19 = vld [vmem:[#allocation16 + $0xb0] sm:$0xf0]  ;;  %v2132_v35 = vld [vmem:[#allocation16 + $0x88] sm:$0xf] }
 0x769   :  { %v2145_v21 = vor.u32 %v2374_v16, %v2142_v19  ;;  %v2356_v19 = vld [vmem:[#allocation16 + $0xc] sm:$0xf0] }
 0x76a   :  { %2057 = vmatmul.msk.bf16.vlgmr.msrb.gmra.mxu0 %vm478_vm7, %v1039_v32  ;;  %v2373_v32 = vld [vmem:[#allocation16 + $0x94] sm:$0xf0] }
 0x76b   :  { %1354 = vmatpush.bf16.msrb.mxu2 %v2145_v21  ;;  %v2061_v21 = vor.u32 %v2356_v19, %v2060_v14 }
 0x76f   :  { %v1037_v36 = vpop.f32.mrf.mxu3 }
 0x7e7   :  { %v1068_v38 = vpop.f32.mrf.mxu0 }
 0x7e8   :  { %v1073_v39 = vadd.f32 %v1068_v38, %v925_v30  ;;  %v2370_v30 = vld [vmem:[#allocation16 + $0x84] sm:$0xf]  ;;  %v2371_v38 = vld [vmem:[#allocation16 + $0x8c] sm:$0xf] }
 0x7e9   :  { %v2129_v36 = vor.u32 %v2370_v30, %v2126_v34  ;;  %v2070_v30 = vld [vmem:[#allocation16 + $0x18] sm:$0xf0] }
 0x7ea   :  { %v1079_v40 = vadd.f32 %v2443_v37, %v1073_v39  ;;  %v2134_v39 = vld [vmem:[#allocation16 + $0x98] sm:$0xf0]  ;;  %v2073_v33 = vor.u32 %v2355_v26, %v2070_v30 }
 0x7eb   :  { %1355 = vmatpush.bf16.msrb.mxu2 %v2129_v36 }
 0x7ec   :  { %v3084_v43 = vadd.f32 %v1079_v40, %v2929_v0  ;;  %v2137_v40 = vor.u32 %v2371_v38, %v2134_v39 }
 0x7ee   :  { %1085 = vadd.xlane.f32.xlu2 %v3084_v43  ;;  %1383 = vmatpush.bf16.msra.mxu0 %v2137_v40 }
 0x7ef   :  { %v1070_v41 = vpop.f32.mrf.mxu0 }
 0x7f0   :  { %v1074_v46 = vadd.f32 %v1070_v41, %v926_v45  ;;  %v2368_v45 = vld [vmem:[#allocation16 + $0x6c] sm:$0xf0]  ;;  %v2366_v41 = vld [vmem:[#allocation16 + $0x64] sm:$0xf] }
 0x7f2   :  { %v1080_v6 = vadd.f32 %v2443_v37, %v1074_v46  ;;  %v2133_v37 = vor.u32 %v2373_v32, %v2132_v35  ;;  %v2109_v46 = vor.u32 %v2368_v45, %v2108_v42 }
 0x7f4   :  { %v3088_v47 = vadd.f32 %v1080_v6, %v2932_v1  ;;  %1369 = vmatpush.bf16.msrb.mxu3 %v2133_v37  ;;  %v2110_v6 = vld [vmem:[#allocation16 + $0x70] sm:$0xf0]  ;;  %1342 = vmatpush.bf16.msrb.mxu1 %v2109_v46 }
 0x7f6   :  { %1087 = vadd.xlane.f32.xlu0 %v3088_v47 }
 0x7f8   :  { %1343 = vmatpush.bf16.msrb.mxu1 %v2093_v55 }
 0x7fc   :  { %1344 = vmatpush.bf16.msrb.mxu1 %v2077_v15  ;;  %v2416_v15 = vld [vmem:[#allocation17 + $0xf0] sm:$0xff] }
 0x800   :  { %1345 = vmatpush.bf16.msrb.mxu1 %v2061_v21 }
 0x861   :  { %v1086_v48 = vpop.xlane.xlu2 %1085 }
 0x862   :  { %v1089_v49 = vmul.f32 %v1086_v48, %v2935_v8  ;;  %v2116_v48 = vld [vmem:[#allocation16 + $0x68] sm:$0xf] }
 0x864   :  { %v3093_v50 = vsub.f32 %v3084_v43, %v1089_v49  ;;  %v2369_v49 = vld [vmem:[#allocation16 + $0x74] sm:$0xf0] }
 0x866   :  { %v1093_v0 = vmul.f32 %v3093_v50, %v3093_v50 }
 0x868   :  { %1095 = vadd.xlane.f32.xlu2 %v1093_v0  ;;  %v2113_v0 = vor.u32 %v2366_v41, %v2110_v6 }
 0x869   :  { %v1088_v51 = vpop.xlane.xlu0 %1087 }
 0x86a   :  { %v1090_v52 = vmul.f32 %v1088_v51, %v2935_v8  ;;  %v2117_v51 = vor.u32 %v2369_v49, %v2116_v48  ;;  %1356 = vmatpush.bf16.msrb.mxu2 %v2113_v0  ;;  %v2444_v0 = vld [vmem:[#allocation13] ss:$0 sm:$0xff] }
 0x86c   :  { %v3099_v53 = vsub.f32 %v3088_v47, %v1090_v52  ;;  %v2367_v52 = vld [vmem:[#allocation16 + $0x6c] sm:$0xf]  ;;  %1370 = vmatpush.bf16.msrb.mxu3 %v2117_v51 }
 0x86e   :  { %v1094_v1 = vmul.f32 %v3099_v53, %v3099_v53  ;;  %1357 = vmatpush.bf16.msrb.mxu2 %v2097_v11  ;;  %v2417_v11 = vld [vmem:[#allocation17 + $0xf8] sm:$0xff] }
 0x870   :  { %1097 = vadd.xlane.f32.xlu1 %v1094_v1  ;;  %v2118_v1 = vld [vmem:[#allocation16 + $0x78] sm:$0xf0]  ;;  %1371 = vmatpush.bf16.msrb.mxu3 %v2101_v59 }
 0x871   :  { %v2121_v9 = vor.u32 %v2367_v52, %v2118_v1 }
 0x872   :  { %1358 = vmatpush.bf16.msrb.mxu2 %v2081_v7  ;;  %v2409_v7 = vld [vmem:[#allocation17 + $0xb8] sm:$0xff] }
 0x873   :  { %1384 = vmatpush.bf16.msra.mxu0 %v2121_v9 }
 0x874   :  { %1372 = vmatpush.bf16.msrb.mxu3 %v2085_v10 }
 0x876   :  { %1359 = vmatpush.bf16.msrb.mxu2 %v2065_v22 }
 0x877   :  { %1385 = vmatpush.bf16.msra.mxu0 %v2105_v61 }
 0x878   :  { %1373 = vmatpush.bf16.msrb.mxu3 %v2069_v28 }
 0x87b   :  { %1386 = vmatpush.bf16.msra.mxu0 %v2089_v17  ;;  %v2415_v17 = vld [vmem:[#allocation17 + $0xe8] sm:$0xff] }
 0x87c   :  { %1854 = vmatpush.bf16.msra.mxu3 %v2409_v7  ;;  %v2404_v7 = vld [vmem:[#allocation17 + $0x90] sm:$0xff] }
 0x87f   :  { %1387 = vmatpush.bf16.msra.mxu0 %v2073_v33  ;;  %v2390_v33 = vld [vmem:[#allocation17 + $0x20] sm:$0xff] }
 0x880   :  { %1855 = vmatpush.bf16.msra.mxu3 %v2408_v25  ;;  %v2403_v25 = vld [vmem:[#allocation17 + $0x88] sm:$0xff] }
 0x883   :  { %1868 = vmatpush.bf16.msrb.mxu0 %v2417_v11  ;;  %v2387_v11 = vld [vmem:[#allocation17 + $0x8] sm:$0xff] }
 0x887   :  { %1869 = vmatpush.bf16.msrb.mxu0 %v2416_v15 }
 0x88b   :  { %1870 = vmatpush.bf16.msrb.mxu0 %v2415_v17 }
 0x8db   :  { %v1096_v5 = vpop.xlane.xlu2 %1095 }
 0x8dc   :  { %v1099_v16 = vmul.f32 %v1096_v5, %v2935_v8  ;;  %v2401_v5 = vld [vmem:[#allocation17 + $0x78] sm:$0xff] }
 0x8dd   :  { %1840 = vmatpush.bf16.msra.mxu2 %v2401_v5 }
 0x8de   :  { %v1101_v24 = vadd.f32 1e-05, %v1099_v16  ;;  %v2391_v16 = vld [vmem:[#allocation17 + $0x28] sm:$0xff] }
 0x8e0   :  { %2485 = vrsqrt.f32 %v1101_v24  ;;  %vm1109_vm12 = vweird.f32 %v1101_v24 }
 0x8e1   :  { %1841 = vmatpush.bf16.msra.mxu2 %v2400_v23  ;;  %v2395_v23 = vld [vmem:[#allocation17 + $0x48] sm:$0xff] }
 0x8e3   :  { %v1098_v34 = vpop.xlane.xlu1 %1097 }
 0x8e4   :  { %v1100_v35 = vmul.f32 %v1098_v34, %v2935_v8  ;;  %v2414_v34 = vld [vmem:[#allocation17 + $0xe0] sm:$0xff] }
 0x8e5   :  { %1871 = vmatpush.bf16.msrb.mxu0 %v2414_v34 }
 0x8e6   :  { %v2486_v32 = vpop.eup %2485  ;;  %v1102_v36 = vadd.f32 1e-05, %v1100_v35 }
 0x8e7   :  { %v1104_v37 = vmul.f32 %v2486_v32, %v1101_v24  ;;  %vm1110_vm11 = vweird.f32 %v2486_v32 }
 0x8e8   :  { %2487 = vrsqrt.f32 %v1102_v36  ;;  %vm1111_vm13 = vmor %vm1109_vm12, %vm1110_vm11  ;;  %vm1119_vm15 = vweird.f32 %v1102_v36 }
 0x8e9   :  { %v1105_v38 = vmul.f32 %v2486_v32, %v1104_v37  ;;  %v2399_v37 = vld [vmem:[#allocation17 + $0x68] sm:$0xff] }
 0x8ea   :  { %1842 = vmatpush.bf16.msra.mxu2 %v2399_v37  ;;  %v2394_v37 = vld [vmem:[#allocation17 + $0x40] sm:$0xff] }
 0x8eb   :  { %v1106_v39 = vmul.f32 0.5, %v1105_v38  ;;  %v2407_v38 = vld [vmem:[#allocation17 + $0xa8] sm:$0xff] }
 0x8ec   :  { %1856 = vmatpush.bf16.msra.mxu3 %v2407_v38  ;;  %v2402_v38 = vld [vmem:[#allocation17 + $0x80] sm:$0xff] }
 0x8ed   :  { %v1107_v40 = vsub.f32 1.5, %v1106_v39 }
 0x8ee   :  { %v2488_v42 = vpop.eup %2487 }
 0x8ef   :  { %v1108_v45 = vmul.f32 %v2486_v32, %v1107_v40  ;;  %v1114_v41 = vmul.f32 %v2488_v42, %v1102_v36  ;;  %vm1120_vm14 = vweird.f32 %v2488_v42 }
 0x8f0   :  { %vm1121_vm0 = vmor %vm1119_vm15, %vm1120_vm14 }
 0x8f1   :  { %v1115_v46 = vmul.f32 %v2488_v42, %v1114_v41  ;;  %v1112_v6 = vsel %vm1111_vm13, %v2486_v32, %v1108_v45 }
 0x8f2   :  { %v1123_v8 = vmul.f32 %v1112_v6, %v3093_v50  ;;  %v3110_v50 = vld [vmem:[%s3291_s10] sm:$0xf] }
 0x8f3   :  { %v1116_v48 = vmul.f32 0.5, %v1115_v46  ;;  %v1170_v57 = vperm.slane %v3110_v50, 0  ;;  %v1173_v58 = vperm.slane %v3110_v50, 3  ;;  %v1171_v63 = vperm.slane %v3110_v50, 1 }
 0x8f4   :  { %v1128_v9 = vmul.f32 %v2444_v0, %v1123_v8  ;;  %v1172_v44 = vperm.slane %v3110_v50, 2  ;;  %v2398_v8 = vld [vmem:[#allocation17 + $0x60] sm:$0xff] }
 0x8f5   :  { %v1117_v49 = vsub.f32 1.5, %v1116_v48  ;;  %v2389_v48 = vld [vmem:[#allocation17 + $0x18] sm:$0xff]  ;;  %1843 = vmatpush.bf16.msra.mxu2 %v2398_v8 }
 0x8f6   :  { %v1133_v29 = vadd.f32 %v2445_v54, %v1128_v9  ;;  %v2412_v9 = vld [vmem:[#allocation17 + $0xd0] sm:$0xff] }
 0x8f7   :  { %v1118_v51 = vmul.f32 %v2488_v42, %v1117_v49  ;;  %v2413_v49 = vld [vmem:[#allocation17 + $0xd8] sm:$0xff] }
 0x8f8   :  { %1872 = vmatpush.bf16.msrb.mxu0 %v2413_v49 }
 0x8f9   :  { %v1122_v52 = vsel %vm1121_vm0, %v2488_v42, %v1118_v51 }
 0x8fa   :  { %v1124_v1 = vmul.f32 %v1122_v52, %v3099_v53  ;;  %v2393_v53 = vld [vmem:[#allocation17 + $0x38] sm:$0xff] }
 0x8fb   :  { %1826 = vmatpush.bf16.msra.mxu1 %v2393_v53 }
 0x8fc   :  { %v1129_v27 = vmul.f32 %v2444_v0, %v1124_v1  ;;  %v2406_v0 = vld [vmem:[#allocation17 + $0xa0] sm:$0xff]  ;;  %v2388_v1 = vld [vmem:[#allocation17 + $0x10] sm:$0xff]  ;;  %1873 = vmatpush.bf16.msrb.mxu0 %v2412_v9 }
 0x8fd   :  { %1857 = vmatpush.bf16.msra.mxu3 %v2406_v0 }
 0x8fe   :  { %v1134_v55 = vadd.f32 %v2445_v54, %v1129_v27 }
 0x8ff   :  { %1827 = vmatpush.bf16.msra.mxu1 %v2392_v2 }
 0x900   :  { %v1135_v56 = vpack.c.bf16 %v1134_v55, %v1133_v29  ;;  %v2397_v29 = vld [vmem:[#allocation17 + $0x58] sm:$0xff] }
 0x901   :  { %v2405_v55 = vld [vmem:[#allocation17 + $0x98] sm:$0xff]  ;;  %1844 = vmatpush.bf16.msra.mxu2 %v2397_v29 }
 0x902   :  { %1346 = vmatmul.bf16.vlgmr.msrb.gmra.mxu1 %v1135_v56  ;;  %1360 = vmatmul.bf16.vlgmr.msrb.gmra.mxu2 %v1135_v56 }
 0x903   :  { %1374 = vmatmul.bf16.vlgmr.msrb.gmra.mxu3 %v1135_v56  ;;  %1388 = vmatmul.bf16.vlgmr.msra.gmra.mxu0 %v1135_v56 }
 0x904   :  { %1828 = vmatpush.bf16.msra.mxu1 %v2391_v16  ;;  %1858 = vmatpush.bf16.msra.mxu3 %v2405_v55  ;;  %v2410_v16 = vld [vmem:[#allocation17 + $0xc0] sm:$0xff] }
 0x908   :  { %1829 = vmatpush.bf16.msra.mxu1 %v2390_v33  ;;  %1859 = vmatpush.bf16.msra.mxu3 %v2404_v7 }
 0x90c   :  { %1830 = vmatpush.bf16.msra.mxu1 %v2389_v48  ;;  %1860 = vmatpush.bf16.msra.mxu3 %v2403_v25 }
 0x910   :  { %1831 = vmatpush.bf16.msra.mxu1 %v2388_v1  ;;  %1861 = vmatpush.bf16.msra.mxu3 %v2402_v38 }
 0x914   :  { %1832 = vmatpush.bf16.msra.mxu1 %v2387_v11 }
 0x97f   :  { %v1347_v59 = vpop.f32.mrf.mxu1 }
 0x980   :  { %v3114_v31 = vadd.f32 %v1347_v59, %v1170_v57  ;;  %v1389_v60 = vpop.f32.mrf.mxu0  ;;  %v2411_v59 = vld [vmem:[#allocation17 + $0xc8] sm:$0xff] }
 0x981   :  { %v3116_v61 = vadd.f32 %v1389_v60, %v1173_v58  ;;  %1874 = vmatpush.bf16.msrb.mxu0 %v2411_v59 }
 0x982   :  { %v2186_v62 = vmul.f32 -1.702, %v3114_v31 }
 0x983   :  { %v2189_v3 = vmul.f32 -1.702, %v3116_v61 }
 0x984   :  { %v1410_v4 = vmul.f32 1.442695, %v2186_v62 }
 0x985   :  { %v1416_v10 = vmul.f32 1.442695, %v2189_v3  ;;  %v1361_v12 = vpop.f32.mrf.mxu2  ;;  %1875 = vmatpush.bf16.msrb.mxu0 %v2410_v16 }
 0x986   :  { %2489 = vpow2.f32 %v1410_v4  ;;  %v3122_v13 = vadd.f32 %v1361_v12, %v1171_v63  ;;  %v1375_v14 = vpop.f32.mrf.mxu3  ;;  %v2396_v4 = vld [vmem:[#allocation17 + $0x50] sm:$0xff] }
 0x987   :  { %2491 = vpow2.f32 %v1416_v10  ;;  %v3126_v19 = vadd.f32 %v1375_v14, %v1172_v44  ;;  %v1349_v20 = vpop.f32.mrf.mxu1  ;;  %1845 = vmatpush.bf16.msra.mxu2 %v2396_v4  ;;  %v2386_v14 = vld [vmem:[#allocation17] sm:$0xff] }
 0x988   :  { %v2187_v18 = vmul.f32 -1.702, %v3122_v13  ;;  %v3129_v21 = vadd.f32 %v1349_v20, %v1170_v57  ;;  %v1391_v22 = vpop.f32.mrf.mxu0  ;;  %1833 = vmatpush.bf16.msra.mxu1 %v2386_v14 }
 0x989   :  { %v2188_v26 = vmul.f32 -1.702, %v3126_v19  ;;  %v3132_v24 = vadd.f32 %v1391_v22, %v1173_v58 }
 0x98a   :  { %v1412_v28 = vmul.f32 1.442695, %v2187_v18  ;;  %v2190_v30 = vmul.f32 -1.702, %v3129_v21 }
 0x98b   :  { %v2193_v35 = vmul.f32 -1.702, %v3132_v24  ;;  %v1414_v46 = vmul.f32 1.442695, %v2188_v26  ;;  %1846 = vmatpush.bf16.msra.mxu2 %v2395_v23 }
 0x98c   :  { %v2490_v32 = vpop.eup %2489  ;;  %2493 = vpow2.f32 %v1412_v28  ;;  %v1418_v36 = vmul.f32 1.442695, %v2190_v30 }
 0x98d   :  { %v2492_v39 = vpop.eup %2491  ;;  %v3136_v40 = vadd.f32 1.0, %v2490_v32  ;;  %v1424_v42 = vmul.f32 1.442695, %v2193_v35  ;;  %v1363_v45 = vpop.f32.mrf.mxu2 }
 0x98e   :  { %v3138_v41 = vadd.f32 1.0, %v2492_v39  ;;  %2495 = vpow2.f32 %v1418_v36  ;;  %v3140_v6 = vadd.f32 %v1363_v45, %v1171_v63  ;;  %v1377_v3 = vpop.f32.mrf.mxu3 }
 0x98f   :  { %2497 = vrcp.f32 %v3136_v40  ;;  %v3168_v18 = vadd.f32 %v1377_v3, %v1172_v44  ;;  %v1443_v22 = vand.u32 2147483647, %v3136_v40  ;;  %v1445_v26 = vand.u32 2147483648, %v3136_v40  ;;  %1847 = vmatpush.bf16.msra.mxu2 %v2394_v37 }
 0x990   :  { %2499 = vrcp.f32 %v3138_v41  ;;  %v2191_v51 = vmul.f32 -1.702, %v3140_v6  ;;  %v1488_v28 = vand.u32 2147483647, %v3138_v41  ;;  %v1490_v34 = vand.u32 2147483648, %v3138_v41 }
 0x991   :  { %2501 = vpow2.f32 %v1424_v42  ;;  %v2192_v35 = vmul.f32 -1.702, %v3168_v18  ;;  %vm1439_vm2 = vweird.f32 %v3136_v40  ;;  %vm3183_vm3 = vcmp.eq.f32.partialorder %v1443_v22, 8.507059e+37 }
 0x992   :  { %v2494_v52 = vpop.eup %2493  ;;  %2503 = vpow2.f32 %v1414_v46  ;;  %v1420_v57 = vmul.f32 1.442695, %v2191_v51  ;;  %vm1484_vm4 = vweird.f32 %v3138_v41  ;;  %v1446_v42 = vor.u32 1.1754944e-38, %v1445_v26 }
 0x993   :  { %v3145_v54 = vadd.f32 1.0, %v2494_v52  ;;  %vm3195_vm7 = vcmp.eq.f32.partialorder %v1488_v28, 8.507059e+37  ;;  %v1491_v51 = vor.u32 1.1754944e-38, %v1490_v34  ;;  %v1422_v9 = vmul.f32 1.442695, %v2192_v35 }
 0x994   :  { %v2496_v27 = vpop.eup %2495 }
 0x995   :  { %v3147_v56 = vpop.eup %2497  ;;  %2505 = vrcp.f32 %v3145_v54  ;;  %v3156_v15 = vadd.f32 1.0, %v2496_v27  ;;  %v1460_v26 = vand.u32 2147483648, %v3145_v54 }
 0x996   :  { %v3150_v58 = vpop.eup %2499  ;;  %v1435_v53 = vmul.f32 %v3147_v56, %v3136_v40  ;;  %2507 = vpow2.f32 %v1420_v57  ;;  %vm1440_vm1 = vweird.f32 %v3147_v56 }
 0x997   :  { %v2502_v60 = vpop.eup %2501  ;;  %v1480_v62 = vmul.f32 %v3150_v58, %v3138_v41  ;;  %2509 = vrcp.f32 %v3156_v15  ;;  %vm3190_vm5 = vmor %vm1439_vm2, %vm1440_vm1  ;;  %vm1485_vm6 = vweird.f32 %v3150_v58  ;;  %vm1499_vm8 = vweird.f32 %v3156_v15 }
 0x998   :  { %v2504_v63 = vpop.eup %2503  ;;  %v1436_v2 = vsub.f32 1.0, %v1435_v53  ;;  %v3158_v5 = vadd.f32 1.0, %v2502_v60  ;;  %v1503_v27 = vand.u32 2147483647, %v3156_v15  ;;  %v1505_v29 = vand.u32 2147483648, %v3156_v15  ;;  %vm3219_vm9 = vmor %vm1484_vm4, %vm1485_vm6 }
 0x999   :  { %v1481_v12 = vsub.f32 1.0, %v1480_v62  ;;  %v3164_v20 = vadd.f32 1.0, %v2504_v63  ;;  %vm1454_vm2 = vweird.f32 %v3145_v54  ;;  %v1461_v39 = vor.u32 1.1754944e-38, %v1460_v26 }
 0x99a   :  { %v1437_v10 = vmul.f32 %v3147_v56, %v1436_v2  ;;  %2511 = vrcp.f32 %v3158_v5  ;;  %v1548_v62 = vand.u32 2147483647, %v3158_v5  ;;  %v1550_v63 = vand.u32 2147483648, %v3158_v5 }
 0x99b   :  { %v3162_v17 = vpop.eup %2505  ;;  %v1482_v50 = vmul.f32 %v3150_v58, %v1481_v12  ;;  %2513 = vrcp.f32 %v3164_v20  ;;  %vm1504_vm14 = vcmp.eq.f32.partialorder %v1503_v27, 8.507059e+37  ;;  %vm1544_vm15 = vweird.f32 %v3158_v5 }
 0x99c   :  { %v1438_v30 = vadd.f32 %v3147_v56, %v1437_v10  ;;  %v1450_v44 = vmul.f32 %v3162_v17, %v3145_v54  ;;  %v2508_v33 = vpop.eup %2507  ;;  %vm1455_vm12 = vweird.f32 %v3162_v17  ;;  %v1551_v23 = vor.u32 1.1754944e-38, %v1550_v63 }
 0x99d   :  { %v2510_v32 = vpop.eup %2509  ;;  %v1483_v49 = vadd.f32 %v3150_v58, %v1482_v50  ;;  %v3204_v0 = vadd.f32 1.0, %v2508_v33  ;;  %vm1549_vm1 = vcmp.eq.f32.partialorder %v1548_v62, 8.507059e+37 }
 0x99e   :  { %v1495_v40 = vmul.f32 %v2510_v32, %v3156_v15  ;;  %v1442_v48 = vsel %vm3190_vm5, %v3147_v56, %v1438_v30  ;;  %v1451_v8 = vsub.f32 1.0, %v1450_v44  ;;  %vm1500_vm10 = vweird.f32 %v2510_v32 }
 0x99f   :  { %2515 = vrcp.f32 %v3204_v0  ;;  %v1447_v56 = vsel %vm3183_vm3, %v1446_v42, %v1442_v48  ;;  %v1487_v59 = vsel %vm3219_vm9, %v3150_v58, %v1483_v49  ;;  %vm1501_vm13 = vmor %vm1499_vm8, %vm1500_vm10  ;;  %v1506_v58 = vor.u32 1.1754944e-38, %v1505_v29 }
 0x9a0   :  { %v2512_v46 = vpop.eup %2511  ;;  %v1496_v52 = vsub.f32 1.0, %v1495_v40  ;;  %v1452_v60 = vmul.f32 %v3162_v17, %v1451_v8  ;;  %2517 = vpow2.f32 %v1422_v9  ;;  %v1554_v4 = vmul.f32 %v1447_v56, %v3114_v31  ;;  %vm3248_vm3 = vmor %vm1454_vm2, %vm1455_vm12 }
 0x9a1   :  { %v1540_v1 = vmul.f32 %v2512_v46, %v3158_v5  ;;  %v3211_v55 = vpop.eup %2513  ;;  %vm1545_vm11 = vweird.f32 %v2512_v46  ;;  %v1492_v14 = vsel %vm3195_vm7, %v1491_v51, %v1487_v59  ;;  %v1458_v5 = vand.u32 2147483647, %v3145_v54 }
 0x9a2   :  { %v1497_v53 = vmul.f32 %v2510_v32, %v1496_v52  ;;  %v1465_v41 = vmul.f32 %v3211_v55, %v3164_v20  ;;  %v1453_v16 = vadd.f32 %v3162_v17, %v1452_v60  ;;  %vm1546_vm0 = vmor %vm1544_vm15, %vm1545_vm11  ;;  %v1557_v50 = vmul.f32 %v1492_v14, %v3116_v61 }
 0x9a3   :  { %v1541_v11 = vsub.f32 1.0, %v1540_v1  ;;  %v1520_v54 = vand.u32 2147483648, %v3204_v0  ;;  %v1518_v38 = vand.u32 2147483647, %v3204_v0  ;;  %vm1459_vm5 = vcmp.eq.f32.partialorder %v1458_v5, 8.507059e+37 }
 0x9a4   :  { %v1498_v2 = vadd.f32 %v2510_v32, %v1497_v53  ;;  %v1457_v35 = vsel %vm3248_vm3, %v3162_v17, %v1453_v16  ;;  %vm1514_vm6 = vweird.f32 %v3204_v0  ;;  %vm1470_vm9 = vweird.f32 %v3211_v55 }
 0x9a5   :  { %v1542_v3 = vmul.f32 %v2512_v46, %v1541_v11  ;;  %v2516_v12 = vpop.eup %2515  ;;  %v1521_v17 = vor.u32 1.1754944e-38, %v1520_v54  ;;  %vm1519_vm8 = vcmp.eq.f32.partialorder %v1518_v38, 8.507059e+37  ;;  %v1475_v1 = vand.u32 2147483648, %v3164_v20 }
 0x9a6   :  { %v1502_v7 = vsel %vm1501_vm13, %v2510_v32, %v1498_v2  ;;  %v1510_v31 = vmul.f32 %v2516_v12, %v3204_v0  ;;  %v2518_v30 = vpop.eup %2517  ;;  %v1466_v32 = vsub.f32 1.0, %v1465_v41  ;;  %vm1515_vm4 = vweird.f32 %v2516_v12 }
 0x9a7   :  { %v1543_v10 = vadd.f32 %v2512_v46, %v1542_v3  ;;  %v1507_v22 = vsel %vm1504_vm14, %v1506_v58, %v1502_v7  ;;  %v1432_v36 = vadd.f32 1.0, %v2518_v30  ;;  %vm1516_vm7 = vmor %vm1514_vm6, %vm1515_vm4  ;;  %vm1469_vm10 = vweird.f32 %v3164_v20  ;;  %v2446_v3 = vld [vmem:[%s3293_s12] ss:$0 sm:$0xff] }
 0x9a8   :  { %v1558_v15 = vmul.f32 %v1507_v22, %v3129_v21  ;;  %v1511_v34 = vsub.f32 1.0, %v1510_v31  ;;  %v1467_v45 = vmul.f32 %v3211_v55, %v1466_v32  ;;  %v1473_v9 = vand.u32 2147483647, %v3164_v20  ;;  %vm1471_vm11 = vmor %vm1469_vm10, %vm1470_vm9 }
 0x9a9   :  { %v1547_v25 = vsel %vm1546_vm0, %v2512_v46, %v1543_v10  ;;  %2519 = vrcp.f32 %v1432_v36  ;;  %v1535_v29 = vand.u32 2147483648, %v1432_v36  ;;  %v1533_v56 = vand.u32 2147483647, %v1432_v36 }
 0x9aa   :  { %v1552_v28 = vsel %vm1549_vm1, %v1551_v23, %v1547_v25  ;;  %v1562_v21 = vpack.c.bf16 %v1558_v15, %v1554_v4  ;;  %v1512_v61 = vmul.f32 %v2516_v12, %v1511_v34  ;;  %v1468_v51 = vadd.f32 %v3211_v55, %v1467_v45 }
 0x9ab   :  { %v1561_v33 = vmul.f32 %v1552_v28, %v3132_v24  ;;  %v1462_v24 = vsel %vm1459_vm5, %v1461_v39, %v1457_v35  ;;  %v1476_v57 = vor.u32 1.1754944e-38, %v1475_v1  ;;  %vm1474_vm13 = vcmp.eq.f32.partialorder %v1473_v9, 8.507059e+37 }
 0x9ac   :  { %1834 = vmatmul.bf16.vlgmr.msra.gmra.mxu1 %v1562_v21  ;;  %v1513_v42 = vadd.f32 %v2516_v12, %v1512_v61  ;;  %v1555_v48 = vmul.f32 %v1462_v24, %v3122_v13  ;;  %v1472_v13 = vsel %vm1471_vm11, %v3211_v55, %v1468_v51  ;;  %vm1529_vm14 = vweird.f32 %v1432_v36 }
 0x9ad   :  { %v1565_v37 = vpack.c.bf16 %v1561_v33, %v1557_v50  ;;  %v1477_v11 = vsel %vm1474_vm13, %v1476_v57, %v1472_v13  ;;  %v1536_v59 = vor.u32 1.1754944e-38, %v1535_v29  ;;  %vm1534_vm0 = vcmp.eq.f32.partialorder %v1533_v56, 8.507059e+37 }
 0x9ae   :  { %v1517_v40 = vsel %vm1516_vm7, %v2516_v12, %v1513_v42  ;;  %v1556_v20 = vmul.f32 %v1477_v11, %v3126_v19 }
 0x9af   :  { %1876 = vmatmul.bf16.vlgmr.msrb.gmra.mxu0 %v1565_v37  ;;  %v1522_v46 = vsel %vm1519_vm8, %v1521_v17, %v1517_v40  ;;  %v2520_v8 = vpop.eup %2519 }
 0x9b0   :  { %v1559_v49 = vmul.f32 %v1522_v46, %v3140_v6  ;;  %v1525_v0 = vmul.f32 %v2520_v8, %v1432_v36  ;;  %vm1530_vm12 = vweird.f32 %v2520_v8 }
 0x9b1   :  { %vm1531_vm15 = vmor %vm1529_vm14, %vm1530_vm12 }
 0x9b2   :  { %v1563_v52 = vpack.c.bf16 %v1559_v49, %v1555_v48  ;;  %v1526_v27 = vsub.f32 1.0, %v1525_v0 }
 0x9b4   :  { %1848 = vmatmul.bf16.vlgmr.msra.gmra.mxu2 %v1563_v52  ;;  %v1527_v6 = vmul.f32 %v2520_v8, %v1526_v27 }
 0x9b6   :  { %v1528_v53 = vadd.f32 %v2520_v8, %v1527_v6 }
 0x9b8   :  { %v1532_v60 = vsel %vm1531_vm15, %v2520_v8, %v1528_v53 }
 0x9b9   :  { %v1537_v62 = vsel %vm1534_vm0, %v1536_v59, %v1532_v60 }
 0x9ba   :  { %v1560_v63 = vmul.f32 %v1537_v62, %v3168_v18 }
 0x9bc   :  { %v1564_v2 = vpack.c.bf16 %v1560_v63, %v1556_v20 }
 0x9be   :  { %1862 = vmatmul.bf16.vlgmr.msra.gmra.mxu3 %v1564_v2 }
 0xa29   :  { %v1835_v55 = vpop.f32.mrf.mxu1 }
 0xa2a   :  { %v1836_v58 = vadd.f32 %v2446_v3, %v1835_v55 }
 0xa2c   :  { %v1877_v7 = vpop.f32.mrf.mxu0 }
 0xa31   :  { %v1837_v10 = vpop.f32.mrf.mxu1 }
 0xa32   :  { %v1838_v22 = vadd.f32 %v2446_v3, %v1837_v10 }
 0xa34   :  { %v1879_v31 = vpop.f32.mrf.mxu0 }
 0xa37   :  { %v1849_v41 = vpop.f32.mrf.mxu2 }
 0xa38   :  { %v1850_v4 = vadd.f32 %v1849_v41, %v1836_v58 }
 0xa3f   :  { %v1851_v16 = vpop.f32.mrf.mxu2 }
 0xa40   :  { %v1852_v18 = vadd.f32 %v1851_v16, %v1838_v22 }
 0xa41   :  { %v1863_v12 = vpop.f32.mrf.mxu3 }
 0xa42   :  { %v1864_v14 = vadd.f32 %v1863_v12, %v1850_v4 }
 0xa44   :  { %v1878_v23 = vadd.f32 %v1877_v7, %v1864_v14 }
 0xa46   :  { %v1882_v19 = vadd.f32 %v1878_v23, %v3084_v43 }
 0xa48   :  { %1884 = vst [vmem:[#allocation19] sm:$0xff] %v1882_v19 }
 0xa49   :  { %v1865_v15 = vpop.f32.mrf.mxu3 }
 0xa4a   :  { %v1866_v25 = vadd.f32 %v1865_v15, %v1852_v18 }
 0xa4c   :  { %v1880_v5 = vadd.f32 %v1879_v31, %v1866_v25 }
 0xa4e   :  { %v1883_v26 = vadd.f32 %v1880_v5, %v3088_v47 }
 0xa50   :  { %1885 = vst [vmem:[#allocation19 + $0x8] sm:$0xff] %v1883_v26 }
 0xa51   :  { %1898 = dma.vmem_to_hbm [thread:$0]  %s1891_s24, 256, %s1893_s3, [#allocation4], %s2806_s18, %s2806_s18, %s2807_s8  }
 0xa52   :  { %2797 = dma.done.wait [#allocation4], 256  }
 0xa53   :  { %2798 = vsyncadd [#allocation4], 4294967040 }
 0xa54   :  { %1903 = vsyncpa [#allocation3], 1 }
 0xa55   :  { %1904 = vsyncpa [#allocation6], 1 }
 0xa56   :  { %1905 = vsyncpa [#allocation9], 1 }
 0xa57   :  { %1906 = vsyncpa [#allocation12], 1 }
 0xa58   :  { %1907 = vsyncpa [#allocation15], 1 }
 0xa59   :  { %1908 = vsyncpa [#allocation18], 1 }
 0xa5a   :  { %1909 = vsyncpa [#allocation4], 1 }

</bundles_post_ra>
